<compile_context>
chip_gen: v6e
topology: v6e:2x2x1
jax: 0.10.0
libtpu: 0.0.40
codegen_flags: <defaults>
</compile_context>

<pallas_src>
import functools

import jax
import jax.numpy as jnp
import numpy as np
from jax.experimental import pallas as pl
from jax.experimental.pallas import tpu as pltpu


def _adaptive_pool3d_kernel(mask_ref, scale_ref, x_ref, o_ref, *, precision):
    # mask_ref : (K, Mo_pad)  exact 0/1 membership matrix, in x.dtype
    # scale_ref: (1, Mo_pad)  f32 per-output-column 1/window_count
    # x_ref    : (B, K)       block of B flattened (n, c) volumes
    # o_ref    : (B, Mo_pad)  pooled output slab (x.dtype)
    acc = jnp.dot(
        x_ref[...],
        mask_ref[...],
        preferred_element_type=jnp.float32,
        precision=precision,
    )
    o_ref[...] = (acc * scale_ref[...]).astype(o_ref.dtype)


def _pool_mask(in_size: int, out_size: int):
    """Exact 0/1 membership matrix (out_size, in_size) + window counts.

    Row i selects the adaptive window [floor(i*in/out), ceil((i+1)*in/out)),
    exactly PyTorch's adaptive pooling windows.
    """
    i = np.arange(out_size)
    starts = (i * in_size) // out_size
    ends = -((-(i + 1) * in_size) // out_size)  # ceil((i+1)*in/out)
    j = np.arange(in_size)
    mask = (j[None, :] >= starts[:, None]) & (j[None, :] < ends[:, None])
    counts = (ends - starts).astype(np.float64)
    return mask.astype(np.float64), counts


def _round_up(a: int, b: int) -> int:
    return (a + b - 1) // b * b


def _choose_rows_per_step(nc, k, mo_pad, x_itemsize, out_itemsize, p_itemsize):
    """Rows of (n, c) volumes per grid step, from a v7x-safe VMEM budget."""
    budget = 48 * 1024 * 1024  # fits v7x's 64 MiB physical VMEM with headroom
    # Pool matrix + scale vector are grid-invariant but still get the default
    # double buffer; account for 2 copies instead of relying on pl.Buffered(1).
    fixed = 2 * k * mo_pad * p_itemsize + 2 * mo_pad * 4
    per_row = 2 * k * x_itemsize + 2 * mo_pad * out_itemsize  # double-buffered
    avail = max(budget - fixed, 0)
    b = (avail // per_row // 8) * 8 if per_row > 0 else 512
    b = max(8, min(int(b), 512))
    # v7x shards the "parallel" axis across 2 TensorCores: prefer >= 2 steps.
    if nc > 8:
        b = min(b, _round_up(-(-nc // 2), 8))
    # Never larger than one step's worth of rows.
    b = min(b, _round_up(nc, 8))
    return b


def adaptive_avg_pool3d(x, output_size):
    """Pallas equivalent of DynamicAdaptiveAvgPool3d.forward(x, output_size)."""
    if isinstance(output_size, int):
        output_size = (output_size, output_size, output_size)

    squeeze_batch = False
    if x.ndim == 4:  # (C, D, H, W) -> add batch dim, like PyTorch accepts
        x = x[None]
        squeeze_batch = True
    N, C, D, H, W = x.shape

    Do = D if output_size[0] is None else int(output_size[0])
    Ho = H if output_size[1] is None else int(output_size[1])
    Wo = W if output_size[2] is None else int(output_size[2])

    K = D * H * W         # contraction size (flattened input volume)
    Mo = Do * Ho * Wo     # pooled volume size
    Mo_pad = _round_up(Mo, 128)  # lane-dense output width (unmasked vst)

    # Fused exact 0/1 membership matrix (Mo, K) and per-output window counts.
    md, cd = _pool_mask(D, Do)
    mh, ch = _pool_mask(H, Ho)
    mw, cw = _pool_mask(W, Wo)
    mask = np.kron(np.kron(md, mh), mw)                       # (Mo, K), 0/1
    counts = (cd[:, None, None] * ch[None, :, None] * cw[None, None, :]).reshape(-1)

    # Transposed + lane-padded; cast to x.dtype (0/1 exactly representable).
    p_t = np.zeros((K, Mo_pad), dtype=np.float32)
    p_t[:, :Mo] = mask.T
    p_t = jnp.asarray(p_t, dtype=x.dtype)

    inv_scale = np.zeros((1, Mo_pad), dtype=np.float32)
    inv_scale[0, :Mo] = 1.0 / counts
    inv_scale = jnp.asarray(inv_scale)

    NC = N * C
    x_flat = x.reshape(NC, K)  # contiguous reshape; no pad, no extra HBM pass

    x_itemsize = x_flat.dtype.itemsize
    out_itemsize = x_itemsize
    p_itemsize = p_t.dtype.itemsize

    B = _choose_rows_per_step(NC, K, Mo_pad, x_itemsize, out_itemsize, p_itemsize)
    grid_steps = pl.cdiv(NC, B)

    # Actual VMEM footprint: double-buffered x and out blocks + (double
    # buffered) grid-invariant pool matrix and scale vector + headroom.
    vmem_bytes = (2 * B * K * x_itemsize + 2 * B * Mo_pad * out_itemsize
                  + 2 * K * Mo_pad * p_itemsize + 2 * Mo_pad * 4)
    vmem_limit = min(max(vmem_bytes + (2 << 20), 32 << 20), 96 << 20)

    # Mem-bound kernel: HIGHEST precision for f32 inputs is hidden under the
    # HBM stream and keeps PyTorch-f32 numerics; bf16 runs the native MXU path.
    precision = (jax.lax.Precision.HIGHEST if x.dtype == jnp.float32
                 else jax.lax.Precision.DEFAULT)

    cost = pl.CostEstimate(
        flops=int(2 * grid_steps * B * K * Mo_pad),
        transcendentals=0,
        bytes_accessed=int(grid_steps * B * K * x_itemsize
                           + K * Mo_pad * p_itemsize
                           + NC * Mo_pad * out_itemsize
                           + Mo_pad * 4),
    )

    out_flat = pl.pallas_call(
        functools.partial(_adaptive_pool3d_kernel, precision=precision),
        out_shape=jax.ShapeDtypeStruct((NC, Mo_pad), x.dtype),
        grid=(grid_steps,),
        in_specs=[
            pl.BlockSpec((K, Mo_pad), lambda i: (0, 0)),   # pool mask (resident)
            pl.BlockSpec((1, Mo_pad), lambda i: (0, 0)),   # 1/count scale row
            pl.BlockSpec((B, K), lambda i: (i, 0)),        # block of volumes
        ],
        out_specs=pl.BlockSpec((B, Mo_pad), lambda i: (i, 0)),
        compiler_params=pltpu.CompilerParams(
            dimension_semantics=("parallel",),
            vmem_limit_bytes=int(vmem_limit),
        ),
        cost_estimate=cost,
    )(p_t, inv_scale, x_flat)

    out = out_flat[:, :Mo].reshape(N, C, Do, Ho, Wo)
    if squeeze_batch:
        out = out[0]
    return out


def _reference_pool3d(x_np, out_sizes):
    """Exact float64 reference with PyTorch adaptive-window semantics."""
    N, C, D, H, W = x_np.shape
    Do, Ho, Wo = out_sizes
    md, cd = _pool_mask(D, Do)
    mh, ch = _pool_mask(H, Ho)
    mw, cw = _pool_mask(W, Wo)
    pd = md / cd[:, None]
    ph = mh / ch[:, None]
    pw = mw / cw[:, None]
    return np.einsum("ncdhw,od,ph,qw->ncopq", x_np.astype(np.float64), pd, ph, pw)


if __name__ == "__main__":
    key = jax.random.PRNGKey(0)
    # Small NCDHW input, consistent with the module's 5D forward.
    # NC=10 deliberately exercises multiple grid steps + the ragged last block.
    N, C, D, H, W = 2, 5, 6, 10, 12
    x = jax.random.normal(key, (N, C, D, H, W), dtype=jnp.float32)
    output_size = (2, 4, 5)  # dynamic output_size argument of forward()

    out = jax.block_until_ready(adaptive_avg_pool3d(x, output_size))
    assert out.shape == (N, C, 2, 4, 5), out.shape

    ref = _reference_pool3d(np.asarray(x), output_size)
    err = float(np.max(np.abs(np.asarray(out, dtype=np.float64) - ref)))
    assert err < 1e-4, f"f32 max abs err {err}"

    # bf16 path: mask in bf16, native single-pass MXU matmul, f32 accumulation.
    x_bf16 = x.astype(jnp.bfloat16)
    out_bf16 = jax.block_until_ready(adaptive_avg_pool3d(x_bf16, output_size))
    ref_bf16 = _reference_pool3d(np.asarray(x_bf16.astype(jnp.float32)), output_size)
    err_bf16 = float(np.max(np.abs(np.asarray(out_bf16, dtype=np.float64) - ref_bf16)))
    assert err_bf16 < 3e-2, f"bf16 max abs err {err_bf16}"

    print("KERNEL_OK")
</pallas_src>

<mosaic_0001>
module attributes {stable_mosaic.version = 11 : i64} {
  func.func @_adaptive_pool3d_kernel(%arg0: i32, %arg1: memref<720x128xf32, #tpu.memory_space<vmem>>, %arg2: memref<1x128xf32, #tpu.memory_space<vmem>>, %arg3: memref<8x720xf32, #tpu.memory_space<vmem>>, %arg4: memref<8x128xf32, #tpu.memory_space<vmem>>) attributes {dimension_semantics = [#tpu.dimension_semantics<parallel>], iteration_bounds = array<i64: 2>, scalar_prefetch = 0 : i64, scratch_operands = 0 : i64, tpu.core_type = #tpu.core_type<tc>, window_params = [{pipeline_mode = #tpu.pipeline_mode<synchronous>, transform_indices = @transform_0, window_bounds = array<i64: 720, 128>}, {pipeline_mode = #tpu.pipeline_mode<synchronous>, transform_indices = @transform_1, window_bounds = array<i64: 1, 128>}, {transform_indices = @transform_2, window_bounds = array<i64: 8, 720>}, {transform_indices = @transform_3, window_bounds = array<i64: 8, 128>}]} {
    %c0 = arith.constant 0 : index
    %c0_0 = arith.constant 0 : index
    %0 = vector.load %arg3[%c0, %c0_0] : memref<8x720xf32, #tpu.memory_space<vmem>>, vector<8x720xf32>
    %c0_1 = arith.constant 0 : index
    %c0_2 = arith.constant 0 : index
    %1 = vector.load %arg1[%c0_1, %c0_2] : memref<720x128xf32, #tpu.memory_space<vmem>>, vector<720x128xf32>
    %cst = arith.constant dense<0.000000e+00> : vector<8x128xf32>
    %2 = tpu.matmul %0, %1, %cst {dimension_numbers = #tpu.dot_dimension_numbers<[1], [0], [0], [1], [0, 0, 1, 1], [], []>, precision = #tpu.contract_precision<fp32>} : vector<8x720xf32>, vector<720x128xf32>, vector<8x128xf32> -> vector<8x128xf32>
    %c0_3 = arith.constant 0 : index
    %c0_4 = arith.constant 0 : index
    %3 = vector.load %arg2[%c0_3, %c0_4] : memref<1x128xf32, #tpu.memory_space<vmem>>, vector<1x128xf32>
    %4 = vector.broadcast %3 : vector<1x128xf32> to vector<8x128xf32>
    %5 = arith.mulf %2, %4 : vector<8x128xf32>
    %c0_5 = arith.constant 0 : index
    %c0_6 = arith.constant 0 : index
    %6 = vector.load %arg4[%c0_5, %c0_6] : memref<8x128xf32, #tpu.memory_space<vmem>>, vector<8x128xf32>
    tpu.vector_store %arg4[%c0_5, %c0_6], %5 {strides = array<i32>} : memref<8x128xf32, #tpu.memory_space<vmem>>, vector<8x128xf32>,
    return
  }
  func.func @transform_0(%arg0: i32) -> (i32, i32) {
    %c0_i32 = arith.constant 0 : i32
    %c0_i32_0 = arith.constant 0 : i32
    %c0_i32_1 = arith.constant 0 : i32
    return %c0_i32, %c0_i32_0 : i32, i32
  }
  func.func @transform_1(%arg0: i32) -> (i32, i32) {
    %c0_i32 = arith.constant 0 : i32
    %c0_i32_0 = arith.constant 0 : i32
    %c0_i32_1 = arith.constant 0 : i32
    return %c0_i32, %c0_i32_0 : i32, i32
  }
  func.func @transform_2(%arg0: i32) -> (i32, i32) {
    %c0_i32 = arith.constant 0 : i32
    %c0_i32_0 = arith.constant 0 : i32
    return %arg0, %c0_i32 : i32, i32
  }
  func.func @transform_3(%arg0: i32) -> (i32, i32) {
    %c0_i32 = arith.constant 0 : i32
    %c0_i32_0 = arith.constant 0 : i32
    return %arg0, %c0_i32 : i32, i32
  }
}

</mosaic_0001>

<bundles_post_ra>
// kernel: tpu_custom_call.1
= control target key start
LH: loop header
LB: loop body
LE: loop exit
PB: predicated region body
PF: predicated region fallthrough
CT: control target
= control target key end

     0   :  { %8 = vsyncpa [#allocation3], 0  ;;  %s5487_s0 = inlined_call_operand.hbm [shape: f32[720,128], index: 0, kind: input, shape index: {}]   ;;  %s5488_s1 = inlined_call_operand.vmem [shape: f32[1,128], index: 1, kind: input, shape index: {}]   ;;  %s5489_s2 = inlined_call_operand.hbm [shape: f32[10,720], index: 2, kind: input, shape index: {}]   ;;  %s5490_s3 = inlined_call_operand.hbm [shape: f32[10,128], index: 3, kind: output, shape index: {}]  }
   0x1   :  { %9 = vsyncpa [#allocation6], 0 }
   0x2   :  { %11 = vsyncpa [#allocation6 + $0x1], 0 }
   0x3   :  { %12 = vsyncpa [#allocation4], 0 }
   0x4   :  { %14 = vsyncpa [#allocation4 + $0x1], 0  ;;  %s3561_s12 = smov 0   ;;  %s3563_s13 = smov 0  }
   0x5   :  { %s3565_s14 = smov 0   ;;  %s3567_s15 = smov 0  }
   0x6 LB: > { %s3582_s16 = sadd.s32 4294967295, %s3533_s15   ;;  %s2915_s17 = sadd.s32 4294967294, %s3533_s15   ;;  %s3533_s15 = sphi %s3567_s15, %s5943_s15   ;;  %s3529_s14 = sphi %s3565_s14, %s5942_s14   ;;  %s3525_s13 = sphi %s3563_s13, %s5941_s13   ;;  %s3521_s12 = sphi %s3561_s12, %s5940_s12  }
   0x7   : > { %p82_p0 = scmp.ne.s32.totalorder %s3525_s13, %s3521_s12  ;;  %p5491_p1 = scmp.eq.s32.totalorder %s3582_s16, 0 }
   0x8   : > { %p112_p3 = scmp.eq.s32.totalorder %s2915_s17, 1  ;;  %p2916_p5 = scmp.ge.s32.totalorder %s3533_s15, 1 }
   0x9   : > { %p3591_p4 = por %p5491_p1, %p82_p0  ;;  %p119_p7 = scmp.lt.s32.totalorder %s3533_s15, 3 }
   0xa   : > { %p3596_p6 = por %p112_p3, %p82_p0  ;;  %s3535_s21 = smov [#allocation2]  }
   0xb   : > { %s5665_s18 = scalar_select %p3591_p4, 1, 0 }
   0xc   : > { %s5666_s19 = scalar_select %p3596_p6, 1, 0 }
   0xd   : > { %p3601_p8 = pnand %p2916_p5, %p119_p7  ;;  %s131_s22 = sshll.u32 %s3535_s21, 4  ;;  %s132_s22 = int_to_ptr.vmem [resolvable:$true] %s131_s22 }
   0xe   : > { %s3615_s24 = sadd.s32 1, %s3533_s15   ;;  %s69_s25 = sadd.s32 1, %s3529_s14 }
   0xf   : > { %s5667_s20 = scalar_select %p3601_p8, 1, 0 }
  0x10   : > { %p3359_p9 = pneg %p3601_p8  ;;  %s66_s26 = ssub.s32 %s3533_s15, %s3615_s24 }
  0x11   : > { %s3422_s27 = scalar_lea.vmem %s132_s22, 11520  ;;  %p3430_p5 = scmp.lt.s32.totalorder %s132_s22, %s132_s22 }
  0x12   : > { %p3610_p11 = pnand %p3359_p9, %p5491_p1  ;;  %p3423_p13 = scmp.ne.s32.totalorder %s132_s22, %s3422_s27 }
  0x13   : > { %p3431_p7 = scmp.lt.s32.totalorder %s3422_s27, %s3422_s27 }
  0x14   : > { %p3413_p12 = pneg %p3610_p11 }
  0x15   : > { %p3432_p10 = por %p3431_p7, %p3430_p5 }
  0x16   : > { %p3425_p0 = pnand %p3423_p13, %p3413_p12 }
  0x18   : > { %p3426_p3 = pneg %p3425_p0 }
  0x1a   : > { %p3433_p2 = pnand %p3432_p10, %p3426_p3 }
  0x1c   : > { %3436 = shalt.err (!%p3433_p2)
}
  0x1d   : > { %s3536_s28 = smov 128   ;;  %s3537_s29 = smov 8  }
  0x1e   : > { %3362 = dma.hbm_to_vmem [thread:$0]  (!%p3610_p11), %s5487_s0, 11520, %s132_s22, [#allocation3], %s3536_s28, %s3536_s28, %s3537_s29  }
  0x1f   : > { %p67_p9 = scmp.eq.s32.totalorder %s66_s26, 0  ;;  %p76_p12 = scmp.ne.s32.totalorder %s3529_s14, %s3525_s13 }
  0x20   : > { %p77_p10 = scmp.eq.s32.totalorder %s3533_s15, 0  ;;  %p3372_p2 = scmp.lt.s32.totalorder %s3533_s15, 2 }
  0x21   : > { %s3632_s5 = scalar_select %p67_p9, %s3529_s14, %s69_s25  }
  0x22   : > { %p78_p13 = por %p77_p10, %p76_p12  ;;  %p5669_p0 = scmp.eq.s32.totalorder %s3582_s16, 1 }
  0x23   : > { %s148_s7 = sand.u32 1, %s3529_s14   ;;  %s3349_s8 = smul.u32 768, %s3533_s15 }
  0x24   : > { %p3636_p3 = por %p5669_p0, %p76_p12  ;;  %s3348_s9 = smul.u32 48, %s148_s7 }
  0x25   : > { %p3642_p5 = pnand %p3372_p2, %p78_p13  ;;  %s3649_s21 = scalar_lea.hbm %s5489_s2, %s3349_s8 }
  0x26   : > { %s5670_s6 = scalar_select %p3636_p3, 1, 0 }
  0x27   : > { %s152_s22 = scalar_lea.vmem [#allocation5], %s3348_s9  ;;  %s149_s25 = scalar_lea.sflag [#allocation6], %s148_s7 }
  0x28   : > { %s160_s23 = sshll.u32 %s152_s22, 4  ;;  %s3437_s26 = scalar_lea.hbm %s3649_s21, 768  ;;  %s161_s23 = int_to_ptr.vmem [resolvable:$true] %s160_s23 }
  0x29   : > { %p3438_p11 = scmp.ne.s32.totalorder %s3649_s21, %s3437_s26  ;;  %p3439_p7 = pneg %p3642_p5 }
  0x2a   : > { %s3442_s29 = scalar_lea.hbm %s5489_s2, 1536  ;;  %p3443_p10 = scmp.lt.s32.totalorder %s3649_s21, %s5489_s2 }
  0x2b   : > { %p3440_p9 = pnand %p3439_p7, %p3438_p11  ;;  %p3444_p2 = scmp.lt.s32.totalorder %s3442_s29, %s3437_s26 }
  0x2d   : > { %p3441_p12 = pneg %p3440_p9  ;;  %p3445_p13 = por %p3444_p2, %p3443_p10 }
  0x2f   : > { %p3446_p0 = pnand %p3445_p13, %p3441_p12 }
  0x31   : > { %3449 = shalt.err (!%p3446_p0)
}
  0x32   : > { %s3450_s8 = scalar_lea.vmem %s161_s23, 768  ;;  %s3538_s7 = smov [#allocation5]  }
  0x33   : > { %p3451_p1 = scmp.ne.s32.totalorder %s161_s23, %s3450_s8  ;;  %s3455_s9 = sshll.u32 %s3538_s7, 4  ;;  %s3456_s9 = int_to_ptr.vmem [resolvable:$false] %s3455_s9 }
  0x34   : > { %s3457_s11 = scalar_lea.vmem %s3456_s9, 1536  ;;  %p3458_p11 = scmp.lt.s32.totalorder %s161_s23, %s3456_s9 }
  0x35   : > { %p3453_p6 = pnand %p3451_p1, %p3439_p7  ;;  %p3459_p9 = scmp.lt.s32.totalorder %s3457_s11, %s3450_s8 }
  0x37   : > { %p3454_p3 = pneg %p3453_p6  ;;  %p3460_p4 = por %p3459_p9, %p3458_p11 }
  0x39   : > { %p3461_p8 = pnand %p3460_p4, %p3454_p3 }
  0x3b   : > { %3464 = shalt.err (!%p3461_p8)
}
  0x3c   : > { %3366 = dma.hbm_to_vmem [thread:$0]  (!%p3642_p5), %s3649_s21, 768, %s161_s23, %s149_s25  }
  0x3d   : > { %p5672_p12 = scmp.ne.s32.totalorder %s5667_s20, 0 }
  0x3f   : > { %169 = sbr.rel (%p5672_p12) target bundleno = 668 (0x29c), region = 32 }
  0x44   : > { %p5673_p10 = scmp.eq.s32.totalorder %s3582_s16, 0 }
  0x46   : > { %3508 = dma.done.wait (%p5673_p10), [#allocation3], 11520   ;;  %p5674_p1 = pmov %p5673_p10 }
  0x47   : > { %s3672_s17 = sand.u32 1, %s3525_s13   ;;  %p5675_p4 = scmp.ne.s32.totalorder %s5665_s18, 0 }
  0x48   : > { %3510 = vsyncadd (%p5674_p1), [#allocation3], 4294955776  ;;  %s3350_s22 = smul.u32 48, %s3672_s17  ;;  %s176_s26 = scalar_lea.sflag [#allocation6], %s3672_s17 }
  0x4a   : > { %s3676_s10 = scalar_lea.vmem [#allocation5], %s3350_s22 }
  0x4b   : > { %3512 = dma.done.wait (%p5675_p4), %s176_s26, 768  }
  0x4c   : > { %3514 = vsyncadd (%p5675_p4), %s176_s26, 4294966528  ;;  %v239_v0 = vld [vmem:[#allocation2 + $0xf8] sm:$0xff]  ;;  %v238_v2 = vld [vmem:[#allocation2 + $0xf0] sm:$0xff]  ;;  %vm298_vm0 = vcmask 654336   ;;  %s2922_s18 = sshll.u32 %s3672_s17, 3  ;;  %s2925_s23 = sshll.u32 %s3582_s16, 7 }
  0x4d   : > { %v223_v1 = vld [vmem:[#allocation2 + $0x78] sm:$0xff]  ;;  %v3682_v3 = vand.u32 4294901760, %v239_v0  ;;  %v3686_v5 = vand.u32 4294901760, %v238_v2  ;;  %v222_v6 = vld [vmem:[#allocation2 + $0x70] sm:$0xff]  ;;  %v237_v7 = vld [vmem:[#allocation2 + $0xe8] sm:$0xff]  ;;  %s201_s25 = scalar_lea.vmem [#allocation7], %s2922_s18  ;;  %s2831_s30 = scalar_lea.hbm %s5490_s3, %s2925_s23 }
  0x4e   : > { %v3684_v4 = vand.u32 4294901760, %v223_v1  ;;  %v221_v8 = vld [vmem:[#allocation2 + $0x68] sm:$0xff]  ;;  %v3688_v9 = vand.u32 4294901760, %v222_v6  ;;  %v3690_v10 = vand.u32 4294901760, %v237_v7  ;;  %v236_v12 = vld [vmem:[#allocation2 + $0xe0] sm:$0xff]  ;;  %v235_v14 = vld [vmem:[#allocation2 + $0xd8] sm:$0xff] }
  0x4f   : > { %v3692_v11 = vand.u32 4294901760, %v221_v8  ;;  %v220_v13 = vld [vmem:[#allocation2 + $0x60] sm:$0xff]  ;;  %2928 = vmatprep.subr.mxu0 %v3682_v3  ;;  %v3695_v15 = vand.u32 4294901760, %v236_v12  ;;  %v3699_v17 = vand.u32 4294901760, %v235_v14  ;;  %v3702_v18 = vsub.f32 %v239_v0, %v3682_v3  ;;  %v3704_v19 = vld [vmem:[#allocation2 + $0x58] sm:$0xff]  ;;  %v3706_v20 = vld [vmem:[#allocation2 + $0xd0] sm:$0xff] }
  0x50   : > { %v3697_v16 = vand.u32 4294901760, %v220_v13  ;;  %v3708_v21 = vld [vmem:[#allocation2 + $0x50] sm:$0xff]  ;;  %2929 = vmatpush3.msra.mxu0 %v3684_v4  ;;  %v3712_v22 = vand.u32 4294901760, %v3704_v19  ;;  %v3715_v23 = vsub.f32 %v223_v1, %v3684_v4  ;;  %v3718_v24 = vand.u32 4294901760, %v3706_v20  ;;  %v3723_v26 = vld [vmem:[#allocation2 + $0xc8] sm:$0xff]  ;;  %v3727_v28 = vld [vmem:[#allocation2 + $0xc0] sm:$0xff] }
  0x51   : > { %v3721_v25 = vsub.f32 %v238_v2, %v3686_v5  ;;  %v3725_v27 = vld [vmem:[#allocation2 + $0x48] sm:$0xff]  ;;  %2930 = vmatprep.subr.mxu0 %v3686_v5  ;;  %v5508_v29 = vand.u32 4294901760, %v3702_v18  ;;  %v3732_v30 = vand.u32 4294901760, %v3708_v21  ;;  %v3735_v31 = vsub.f32 %v222_v6, %v3688_v9  ;;  %v3749_v37 = vld [vmem:[#allocation2 + $0x40] sm:$0xff]  ;;  %v3773_v46 = vld [vmem:[#allocation2 + $0xb8] sm:$0xff]  ;;  %s2833_s27 = sshll.u32 %s201_s25, 4  ;;  %s2834_s27 = int_to_ptr.vmem [resolvable:$true] %s2833_s27 }
  0x52   : > { %5676 = vst [vmem:[#allocation11_spill] sm:$0xff] %v3718_v24  ;;  %v3738_v32 = vand.u32 4294901760, %v3723_v26  ;;  %2931 = vmatpush3.msra.mxu0 %v3688_v9  ;;  %v5506_v33 = vand.u32 4294901760, %v3715_v23  ;;  %v3744_v35 = vsub.f32 %v237_v7, %v3690_v10  ;;  %v3747_v36 = vand.u32 4294901760, %v3725_v27  ;;  %v3783_v51 = vld [vmem:[#allocation2 + $0x38] sm:$0xff]  ;;  %v3790_v56 = vld [vmem:[#allocation2 + $0xb0] sm:$0xff] }
  0x53   : > { %5677 = vst [vmem:[#allocation12_spill] sm:$0xff] %v3732_v30  ;;  %v5505_v34 = vand.u32 4294901760, %v3721_v25  ;;  %2932 = vmatprep.subr.mxu0 %v3690_v10  ;;  %v530_v38 = vsub.f32 %v3702_v18, %v5508_v29  ;;  %v5503_v39 = vand.u32 4294901760, %v3735_v31  ;;  %v3757_v40 = vsub.f32 %v221_v8, %v3692_v11  ;;  %v3802_v61 = vld [vmem:[#allocation2 + $0x30] sm:$0xff]  ;;  %v3814_v2 = vld [vmem:[#allocation2 + $0xa8] sm:$0xff]  ;;  %s2820_s4 = scalar_lea.sflag [#allocation4], %s3672_s17 }
  0x54   : > { %5678 = vst [vmem:[#allocation13_spill] sm:$0xff] %v3738_v32  ;;  %5679 = vst [vmem:[#allocation14_spill] sm:$0xff] %v3747_v36  ;;  %v3760_v41 = vand.u32 4294901760, %v3727_v28  ;;  %2933 = vmatpush3.msra.mxu0 %v3692_v11  ;;  %v418_v42 = vsub.f32 %v3715_v23, %v5506_v33  ;;  %v5501_v44 = vand.u32 4294901760, %v3744_v35  ;;  %v3771_v45 = vsub.f32 %v236_v12, %v3695_v15  ;;  %s3465_s8 = scalar_lea.vmem %s2834_s27, 128  ;;  %p5937_p8 = scmp.ne.s32.totalorder %s5670_s6, 0 }
  0x55   : > { %v537_v43 = vsub.f32 %v3721_v25, %v5505_v34  ;;  %2934 = vmatprep.subr.mxu0 %v3695_v15  ;;  %v531_v47 = vand.u32 4294901760, %v530_v38  ;;  %v425_v48 = vsub.f32 %v3735_v31, %v5503_v39  ;;  %v5500_v49 = vand.u32 4294901760, %v3757_v40  ;;  %v3905_v39 = vld [vmem:[#allocation2 + $0x90] sm:$0xff]  ;;  %p3466_p6 = scmp.ne.s32.totalorder %s2834_s27, %s3465_s8  ;;  %s3540_s7 = smov [#allocation7]  }
  0x56   : > { %5680 = vst [vmem:[#allocation15_spill] sm:$0xff] %v3760_v41  ;;  %v3781_v50 = vand.u32 4294901760, %v3749_v37  ;;  %2935 = vmatpush3.msra.mxu0 %v3697_v16  ;;  %v419_v52 = vand.u32 4294901760, %v418_v42  ;;  %v544_v54 = vsub.f32 %v3744_v35, %v5501_v44  ;;  %v5498_v55 = vand.u32 4294901760, %v3771_v45  ;;  %v3915_v34 = vld [vmem:[#allocation2 + $0x10] sm:$0xff]  ;;  %s3469_s9 = sshll.u32 %s3540_s7, 4  ;;  %s3470_s9 = int_to_ptr.vmem [resolvable:$false] %s3469_s9 }
  0x57   : > { %v538_v53 = vand.u32 4294901760, %v537_v43  ;;  %2936 = vmatprep.subr.mxu0 %v3699_v17  ;;  %2963 = vmatprep.subr.mxu1 %v531_v47  ;;  %v426_v57 = vand.u32 4294901760, %v425_v48  ;;  %v432_v58 = vsub.f32 %v3757_v40, %v5500_v49  ;;  %v3797_v59 = vsub.f32 %v220_v13, %v3697_v16  ;;  %v3825_v13 = vld [vmem:[#allocation2 + $0x28] sm:$0xff]  ;;  %v3892_v49 = vld [vmem:[#allocation2 + $0x18] sm:$0xff]  ;;  %p3467_p3 = pnand %p3466_p6, %p5937_p8  ;;  %s3471_s16 = scalar_lea.vmem %s3470_s9, 256 }
  0x58   : > { %5681 = vst [vmem:[#allocation16_spill] sm:$0xff] %v3781_v50  ;;  %v3800_v60 = vand.u32 4294901760, %v3773_v46  ;;  %2937 = vmatpush3.msra.mxu0 %v3712_v22  ;;  %2964 = vmatpush3.msra.mxu1 %v419_v52  ;;  %v545_v62 = vand.u32 4294901760, %v544_v54  ;;  %v551_v63 = vsub.f32 %v3771_v45, %v5498_v55  ;;  %v3809_v0 = vsub.f32 %v235_v14, %v3699_v17  ;;  %p3472_p7 = scmp.lt.s32.totalorder %s2834_s27, %s3470_s9  ;;  %p3473_p2 = scmp.lt.s32.totalorder %s3471_s16, %s3465_s8 }
  0x59   : > { %v3812_v1 = vand.u32 4294901760, %v3783_v51  ;;  %2938 = vmatprep.subr.mxu0 %v3718_v24  ;;  %2965 = vmatprep.subr.mxu1 %v538_v53  ;;  %v433_v6 = vand.u32 4294901760, %v432_v58  ;;  %v5496_v7 = vand.u32 4294901760, %v3797_v59  ;;  %v3820_v8 = vsub.f32 %v3704_v19, %v3712_v22  ;;  %p3468_p5 = pneg %p3467_p3 }
  0x5a   : > { %5682 = vst [vmem:[#allocation17_spill] sm:$0xff] %v3800_v60  ;;  %v3823_v12 = vand.u32 4294901760, %v3790_v56  ;;  %2939 = vmatpush3.msra.mxu0 %v3732_v30  ;;  %2966 = vmatpush3.msra.mxu1 %v426_v57  ;;  %v552_v14 = vand.u32 4294901760, %v551_v63  ;;  %v5495_v38 = vand.u32 4294901760, %v3809_v0  ;;  %v3831_v42 = vsub.f32 %v3706_v20, %v3718_v24  ;;  %v3848_v20 = vld [vmem:[#allocation2 + $0xa0] sm:$0xff]  ;;  %p3474_p13 = por %p3473_p2, %p3472_p7 }
  0x5b   : > { %5683 = vst [vmem:[#allocation18_spill] sm:$0xff] %v3812_v1  ;;  %v3834_v43 = vand.u32 4294901760, %v3802_v61  ;;  %2940 = vmatprep.subr.mxu0 %v3738_v32  ;;  %2967 = vmatprep.subr.mxu1 %v545_v62  ;;  %v439_v19 = vsub.f32 %v3797_v59, %v5496_v7  ;;  %v5497_v47 = vand.u32 4294901760, %v3820_v8  ;;  %v3843_v48 = vsub.f32 %v3708_v21, %v3732_v30 }
  0x5c   : > { %5684 = vst [vmem:[#allocation19_spill] sm:$0xff] %v3823_v12  ;;  %v3846_v52 = vand.u32 4294901760, %v3814_v2  ;;  %2941 = vmatpush3.msra.mxu0 %v3747_v36  ;;  %2968 = vmatpush3.msra.mxu1 %v433_v6  ;;  %v558_v53 = vsub.f32 %v3809_v0, %v5495_v38  ;;  %v5499_v54 = vand.u32 4294901760, %v3831_v42  ;;  %v3857_v57 = vsub.f32 %v3723_v26, %v3738_v32  ;;  %v3871_v38 = vld [vmem:[#allocation2 + $0x20] sm:$0xff]  ;;  %p3475_p0 = pnand %p3474_p13, %p3468_p5 }
  0x5d   : > { %5685 = vst [vmem:[#allocation20_spill] sm:$0xff] %v3834_v43  ;;  %v3860_v21 = vand.u32 4294901760, %v3825_v13  ;;  %2942 = vmatprep.subr.mxu0 %v3760_v41  ;;  %2969 = vmatprep.subr.mxu1 %v552_v14  ;;  %v440_v58 = vand.u32 4294901760, %v439_v19  ;;  %v446_v62 = vsub.f32 %v3820_v8, %v5497_v47  ;;  %v5502_v63 = vand.u32 4294901760, %v3843_v48  ;;  %v3881_v47 = vld [vmem:[#allocation2 + $0x98] sm:$0xff] }
  0x5e   : > { %5686 = vst [vmem:[#allocation21_spill] sm:$0xff] %v3846_v52  ;;  %v3869_v6 = vsub.f32 %v3725_v27, %v3747_v36  ;;  %2943 = vmatpush3.msra.mxu0 %v3781_v50  ;;  %v559_v26 = vand.u32 4294901760, %v558_v53  ;;  %v565_v14 = vsub.f32 %v3831_v42, %v5499_v54  ;;  %v5504_v19 = vand.u32 4294901760, %v3857_v57  ;;  %v203_v36 = vld [vmem:[%s3676_s10 + $0x8] sm:$0xff] }
  0x5f   : > { %5687 = vst [vmem:[#allocation22_spill] sm:$0xff] %v3860_v21  ;;  %v3879_v7 = vand.u32 4294901760, %v3848_v20  ;;  %2970 = vmatpush3.msra.mxu1 %v440_v58  ;;  %2944 = vmatprep.subr.mxu0 %v3800_v60  ;;  %v447_v27 = vand.u32 4294901760, %v446_v62  ;;  %v453_v55 = vsub.f32 %v3843_v48, %v5502_v63  ;;  %v3890_v54 = vsub.f32 %v3727_v28, %v3760_v41 }
  0x60   : > { %v5507_v53 = vand.u32 4294901760, %v3869_v6  ;;  %2971 = vmatprep.subr.mxu1 %v559_v26  ;;  %2945 = vmatpush3.msra.mxu0 %v3812_v1  ;;  %v566_v44 = vand.u32 4294901760, %v565_v14  ;;  %v572_v58 = vsub.f32 %v3857_v57, %v5504_v19  ;;  %v3899_v62 = vand.u32 4294901760, %v3871_v38 }
  0x61   : > { %5688 = vst [vmem:[#allocation23_spill] sm:$0xff] %v3879_v7  ;;  %v3903_v63 = vsub.f32 %v3749_v37, %v3781_v50  ;;  %2972 = vmatpush3.msra.mxu1 %v447_v27  ;;  %2946 = vmatprep.subr.mxu0 %v3823_v12  ;;  %v454_v28 = vand.u32 4294901760, %v453_v55  ;;  %v5511_v14 = vand.u32 4294901760, %v3890_v54  ;;  %v3913_v19 = vand.u32 4294901760, %v3881_v47 }
  0x62   : > { %5689 = vst [vmem:[#allocation24_spill] sm:$0xff] %v3899_v62  ;;  %v460_v26 = vsub.f32 %v3869_v6, %v5507_v53  ;;  %2973 = vmatprep.subr.mxu1 %v566_v44  ;;  %2947 = vmatpush3.msra.mxu0 %v3834_v43  ;;  %v573_v37 = vand.u32 4294901760, %v572_v58  ;;  %v3921_v55 = vsub.f32 %v3773_v46, %v3800_v60  ;;  %v3924_v33 = vand.u32 4294901760, %v3892_v49  ;;  %v3926_v53 = vld [vmem:[#allocation2 + $0x88] sm:$0xff] }
  0x63   : > { %v5514_v27 = vand.u32 4294901760, %v3903_v63  ;;  %2974 = vmatpush3.msra.mxu1 %v454_v28  ;;  %2948 = vmatprep.subr.mxu0 %v3846_v52  ;;  %v579_v44 = vsub.f32 %v3890_v54, %v5511_v14  ;;  %v3934_v58 = vsub.f32 %v3783_v51, %v3812_v1  ;;  %v3937_v46 = vand.u32 4294901760, %v3905_v39  ;;  %v3951_v51 = vld [vmem:[#allocation2 + $0x8] sm:$0xff] }
  0x64   : > { %5690 = vst [vmem:[#allocation25_spill] sm:$0xff] %v3924_v33  ;;  %v461_v29 = vand.u32 4294901760, %v460_v26  ;;  %2975 = vmatprep.subr.mxu1 %v573_v37  ;;  %2949 = vmatpush3.msra.mxu0 %v3860_v21  ;;  %v3946_v60 = vsub.f32 %v3790_v56, %v3823_v12  ;;  %v3949_v14 = vand.u32 4294901760, %v3915_v34  ;;  %v3960_v26 = vand.u32 4294901760, %v3926_v53  ;;  %v3962_v56 = vld [vmem:[#allocation2 + $0x80] sm:$0xff] }
  0x65   : > { %5691 = vst [vmem:[#allocation26_spill] sm:$0xff] %v3937_v46  ;;  %v467_v28 = vsub.f32 %v3903_v63, %v5514_v27  ;;  %2950 = vmatprep.subr.mxu0 %v3879_v7  ;;  %v580_v37 = vand.u32 4294901760, %v579_v44  ;;  %v3957_v27 = vsub.f32 %v3802_v61, %v3834_v43  ;;  %v5694_v50 = vand.u32 4294901760, %v3921_v55  ;;  %v3985_v44 = vld [vmem:[#allocation2] sm:$0xff] }
  0x66   : > { %5692 = vst [vmem:[#allocation27_spill] sm:$0xff] %v3949_v14  ;;  %2976 = vmatpush3.msra.mxu1 %v461_v29  ;;  %5693 = vst [vmem:[#allocation28_spill] sm:$0xff] %v3960_v26  ;;  %2951 = vmatpush3.msra.mxu0 %v3899_v62  ;;  %v3971_v1 = vsub.f32 %v3814_v2, %v3846_v52  ;;  %v5696_v61 = vand.u32 4294901760, %v3934_v58  ;;  %v3979_v41 = vand.u32 4294901760, %v3951_v51  ;;  %v3993_v52 = vand.u32 4294901760, %v3962_v56 }
  0x67   : > { %v468_v12 = vand.u32 4294901760, %v467_v28  ;;  %v586_v29 = vsub.f32 %v3921_v55, %v5694_v50  ;;  %2977 = vmatprep.subr.mxu1 %v580_v37  ;;  %2952 = vmatprep.subr.mxu0 %v3913_v19  ;;  %v3983_v50 = vsub.f32 %v3825_v13, %v3860_v21  ;;  %v5697_v37 = vand.u32 4294901760, %v3946_v60 }
  0x68   : > { %5695 = vst [vmem:[#allocation29_spill] sm:$0xff] %v3971_v1  ;;  %v474_v43 = vsub.f32 %v3934_v58, %v5696_v61  ;;  %2953 = vmatpush3.msra.mxu0 %v3924_v33  ;;  %v5698_v13 = vand.u32 4294901760, %v3957_v27  ;;  %v4003_v21 = vsub.f32 %v3848_v20, %v3879_v7  ;;  %v5699_v30 = vand.u32 4294901760, %v3971_v1 }
  0x69   : > { %2978 = vmatpush3.msra.mxu1 %v468_v12  ;;  %v587_v2 = vand.u32 4294901760, %v586_v29  ;;  %v593_v61 = vsub.f32 %v3946_v60, %v5697_v37  ;;  %2954 = vmatprep.subr.mxu0 %v3937_v46  ;;  %v202_v37 = vld [vmem:[%s3676_s10] sm:$0xff]  ;;  %v4011_v24 = vand.u32 4294901760, %v3985_v44  ;;  %v5700_v20 = vand.u32 4294901760, %v3983_v50 }
  0x6a   : > { %v475_v32 = vand.u32 4294901760, %v474_v43  ;;  %v481_v12 = vsub.f32 %v3957_v27, %v5698_v13  ;;  %2955 = vmatpush3.msra.mxu0 %v3949_v14  ;;  %v600_v43 = vsub.f32 %v3971_v1, %v5699_v30  ;;  %v4015_v13 = vsub.f32 %v3871_v38, %v3899_v62 }
  0x6b   : > { %2979 = vmatprep.subr.mxu1 %v587_v2  ;;  %v594_v28 = vand.u32 4294901760, %v593_v61  ;;  %2956 = vmatprep.subr.mxu0 %v3960_v26  ;;  %v488_v2 = vsub.f32 %v3983_v50, %v5700_v20  ;;  %v5539_v61 = vand.u32 4294901760, %v4003_v21  ;;  %v4022_v7 = vand.u32 4294901760, %v203_v36 }
  0x6c   : > { %2980 = vmatpush3.msra.mxu1 %v475_v32  ;;  %v482_v29 = vand.u32 4294901760, %v481_v12  ;;  %v601_v30 = vand.u32 4294901760, %v600_v43  ;;  %2957 = vmatpush3.msra.mxu0 %v3979_v41  ;;  %v5540_v1 = vand.u32 4294901760, %v4015_v13  ;;  %v4028_v32 = vsub.f32 %v3881_v47, %v3913_v19 }
  0x6d   : > { %5701 = vst [vmem:[#allocation30_spill] sm:$0xff] %v4022_v7  ;;  %2981 = vmatprep.subr.mxu1 %v594_v28  ;;  %v4030_v38 = vand.u32 4294901760, %v202_v37  ;;  %v489_v12 = vand.u32 4294901760, %v488_v2  ;;  %2958 = vmatprep.subr.mxu0 %v3993_v52  ;;  %v607_v20 = vsub.f32 %v4003_v21, %v5539_v61  ;;  %v4037_v28 = vsub.f32 %v203_v36, %v4022_v7 }
  0x6e   : > { %2982 = vmatpush3.msra.mxu1 %v482_v29  ;;  %v4041_v43 = vsub.f32 %v3892_v49, %v3924_v33  ;;  %2959 = vmatpush3.msra.mxu0 %v4011_v24  ;;  %v495_v47 = vsub.f32 %v4015_v13, %v5540_v1  ;;  %v4053_v36 = vsub.f32 %v3905_v39, %v3937_v46 }
  0x6f   : > { %5702 = vst [vmem:[#allocation31_spill] sm:$0xff] %v4030_v38  ;;  %2983 = vmatprep.subr.mxu1 %v601_v30  ;;  %v4049_v2 = vsub.f32 %v202_v37, %v4030_v38  ;;  %v608_v61 = vand.u32 4294901760, %v607_v20  ;;  %v5545_v49 = vand.u32 4294901760, %v4037_v28  ;;  %2998 = vmatprep.subr.mxu0 %v3702_v18  ;;  %v4060_v1 = vsub.f32 %v3915_v34, %v3949_v14 }
  0x70   : > { %2984 = vmatpush3.msra.mxu1 %v489_v12  ;;  %v5548_v30 = vand.u32 4294901760, %v4041_v43  ;;  %v496_v29 = vand.u32 4294901760, %v495_v47  ;;  %v5703_v37 = vand.u32 4294901760, %v4028_v32  ;;  %639 = vmatprep.mubr.f32.mxu1 %v4022_v7  ;;  %v5705_v7 = vand.u32 4294901760, %v4053_v36 }
  0x71   : > { %2985 = vmatprep.subr.mxu1 %v608_v61  ;;  %v401_v20 = vsub.f32 %v4037_v28, %v5545_v49  ;;  %v5704_v12 = vand.u32 4294901760, %v4049_v2  ;;  %v4087_v14 = vsub.f32 %v3951_v51, %v3979_v41  ;;  %v5707_v46 = vand.u32 4294901760, %v4060_v1 }
  0x72   : > { %v614_v33 = vsub.f32 %v4028_v32, %v5703_v37  ;;  %v502_v34 = vsub.f32 %v4041_v43, %v5548_v30  ;;  %v4077_v37 = vsub.f32 %v3926_v53, %v3960_v26  ;;  %2986 = vmatpush3.msra.mxu1 %v496_v29  ;;  %v621_v49 = vsub.f32 %v4053_v36, %v5705_v7 }
  0x73   : > { %v407_v61 = vsub.f32 %v4049_v2, %v5704_v12  ;;  %5706 = vst [vmem:[#allocation32_spill] sm:$0xff] %v4087_v14  ;;  %v402_v30 = vand.u32 4294901760, %v401_v20  ;;  %v509_v53 = vsub.f32 %v4060_v1, %v5707_v46  ;;  %v5555_v12 = vand.u32 4294901760, %v4087_v14 }
  0x74   : > { %v615_v39 = vand.u32 4294901760, %v614_v33  ;;  %v503_v47 = vand.u32 4294901760, %v502_v34  ;;  %v5556_v33 = vand.u32 4294901760, %v4077_v37  ;;  %v622_v26 = vand.u32 4294901760, %v621_v49 }
  0x75   : > { %v408_v29 = vand.u32 4294901760, %v407_v61  ;;  %v4096_v7 = vsub.f32 %v3962_v56, %v3993_v52  ;;  %403 = vmatprep.mubr.f32.mxu0 %v402_v30  ;;  %v510_v51 = vand.u32 4294901760, %v509_v53  ;;  %v4103_v46 = vsub.f32 %v3985_v44, %v4011_v24  ;;  %v5710_v53 = vld [vmem:[#allocation11_spill] sm:$0xff] }
  0x76   : > { %2987 = vmatprep.subr.mxu1 %v615_v39  ;;  %v628_v20 = vsub.f32 %v4077_v37, %v5556_v33  ;;  %v516_v49 = vsub.f32 %v4087_v14, %v5555_v12  ;;  %v5723_v12 = vld [vmem:[#allocation23_spill] sm:$0xff]  ;;  %v5724_v33 = vand.u32 4294901760, %v3702_v18  ;;  %v5732_v18 = vand.u32 4294901760, %v3744_v35 }
  0x77   : > { %5708 = vst [vmem:[#allocation33_spill] sm:$0xff] %v4096_v7  ;;  %2988 = vmatpush3.msra.mxu1 %v503_v47  ;;  %5709 = vst [vmem:[#allocation34_spill] sm:$0xff] %v4103_v46  ;;  %409 = vmatmul.mubr.f32.vlgmr.msra.gmra.mxu0 %v408_v29  ;;  %v5554_v56 = vand.u32 4294901760, %v4096_v7  ;;  %v5553_v39 = vand.u32 4294901760, %v4103_v46  ;;  %v5711_v29 = vld [vmem:[#allocation12_spill] sm:$0xff] }
  0x78   : > { %2989 = vmatprep.subr.mxu1 %v622_v26  ;;  %2999 = vmatpush3.msra.mxu0 %v3715_v23  ;;  %v629_v30 = vand.u32 4294901760, %v628_v20  ;;  %v517_v34 = vand.u32 4294901760, %v516_v49  ;;  %v5713_v20 = vld [vmem:[#allocation13_spill] sm:$0xff]  ;;  %v5714_v49 = vld [vmem:[#allocation14_spill] sm:$0xff] }
  0x79   : > { %2990 = vmatpush3.msra.mxu1 %v510_v51  ;;  %3000 = vmatprep.subr.mxu0 %v3721_v25  ;;  %v635_v44 = vsub.f32 %v4096_v7, %v5554_v56  ;;  %v523_v26 = vsub.f32 %v4103_v46, %v5553_v39  ;;  %v5712_v51 = vld [vmem:[#allocation29_spill] sm:$0xff]  ;;  %v5722_v56 = vld [vmem:[#allocation22_spill] sm:$0xff] }
  0x7a   : > { %776 = vmatprep.mubr.f32.mxu0 %v4037_v28  ;;  %3001 = vmatpush3.msra.mxu0 %v3735_v31  ;;  %v5721_v39 = vld [vmem:[#allocation21_spill] sm:$0xff] }
  0x7b   : > { %2991 = vmatprep.subr.mxu1 %v629_v30  ;;  %3002 = vmatprep.subr.mxu0 %v3744_v35  ;;  %v636_v47 = vand.u32 4294901760, %v635_v44  ;;  %v524_v61 = vand.u32 4294901760, %v523_v26  ;;  %v5715_v30 = vld [vmem:[#allocation15_spill] sm:$0xff]  ;;  %v5717_v44 = vld [vmem:[#allocation17_spill] sm:$0xff]  ;;  %v5718_v26 = vld [vmem:[#allocation18_spill] sm:$0xff]  ;;  %v5737_v35 = vand.u32 4294901760, %v4049_v2 }
  0x7c   : > { %2992 = vmatpush3.msra.mxu1 %v517_v34  ;;  %3003 = vmatpush3.msra.mxu0 %v3757_v40  ;;  %v5716_v34 = vld [vmem:[#allocation16_spill] sm:$0xff] }
  0x7d   : > { %2993 = vmatprep.subr.mxu1 %v636_v47  ;;  %3004 = vmatprep.subr.mxu0 %v3771_v45  ;;  %v5719_v47 = vld [vmem:[#allocation19_spill] sm:$0xff] }
  0x7e   : > { %2994 = vmatpush3.msra.mxu1 %v524_v61  ;;  %3005 = vmatpush3.msra.mxu0 %v3797_v59  ;;  %v5720_v61 = vld [vmem:[#allocation20_spill] sm:$0xff] }
  0x7f   : > { %641 = vmatmul.mubr.f32.vlgmr.msra.gmra.mxu1 %v4030_v38  ;;  %3006 = vmatprep.subr.mxu0 %v3809_v0  ;;  %v5725_v38 = vld [vmem:[#allocation25_spill] sm:$0xff] }
  0x80   : > { %3033 = vmatprep.subr.mxu1 %v3682_v3  ;;  %3007 = vmatpush3.msra.mxu0 %v3820_v8 }
  0x81   : > { %3034 = vmatpush3.msra.mxu1 %v3684_v4  ;;  %3008 = vmatprep.subr.mxu0 %v3831_v42 }
  0x82   : > { %3035 = vmatprep.subr.mxu1 %v3686_v5  ;;  %3009 = vmatpush3.msra.mxu0 %v3843_v48 }
  0x83   : > { %3036 = vmatpush3.msra.mxu1 %v3688_v9  ;;  %3010 = vmatprep.subr.mxu0 %v3857_v57 }
  0x84   : > { %3037 = vmatprep.subr.mxu1 %v3690_v10  ;;  %3011 = vmatpush3.msra.mxu0 %v3869_v6 }
  0x85   : > { %3038 = vmatpush3.msra.mxu1 %v3692_v11  ;;  %3012 = vmatprep.subr.mxu0 %v3890_v54 }
  0x86   : > { %3039 = vmatprep.subr.mxu1 %v3695_v15  ;;  %3013 = vmatpush3.msra.mxu0 %v3903_v63 }
  0x87   : > { %3040 = vmatpush3.msra.mxu1 %v3697_v16  ;;  %3014 = vmatprep.subr.mxu0 %v3921_v55 }
  0x88   : > { %3041 = vmatprep.subr.mxu1 %v3699_v17  ;;  %3015 = vmatpush3.msra.mxu0 %v3934_v58 }
  0x89   : > { %3042 = vmatpush3.msra.mxu1 %v3712_v22  ;;  %3016 = vmatprep.subr.mxu0 %v3946_v60 }
  0x8a   : > { %3043 = vmatprep.subr.mxu1 %v5710_v53  ;;  %3017 = vmatpush3.msra.mxu0 %v3957_v27 }
  0x8b   : > { %3044 = vmatpush3.msra.mxu1 %v5711_v29  ;;  %3018 = vmatprep.subr.mxu0 %v5712_v51 }
  0x8c   : > { %3045 = vmatprep.subr.mxu1 %v5713_v20  ;;  %3019 = vmatpush3.msra.mxu0 %v3983_v50 }
  0x8d   : > { %3046 = vmatpush3.msra.mxu1 %v5714_v49  ;;  %3020 = vmatprep.subr.mxu0 %v4003_v21 }
  0x8e   : > { %3047 = vmatprep.subr.mxu1 %v5715_v30  ;;  %3021 = vmatpush3.msra.mxu0 %v4015_v13 }
  0x8f   : > { %3048 = vmatpush3.msra.mxu1 %v5716_v34  ;;  %3022 = vmatprep.subr.mxu0 %v4028_v32 }
  0x90   : > { %3049 = vmatprep.subr.mxu1 %v5717_v44  ;;  %3023 = vmatpush3.msra.mxu0 %v4041_v43 }
  0x91   : > { %3050 = vmatpush3.msra.mxu1 %v5718_v26  ;;  %3024 = vmatprep.subr.mxu0 %v4053_v36 }
  0x92   : > { %3051 = vmatprep.subr.mxu1 %v5719_v47  ;;  %3025 = vmatpush3.msra.mxu0 %v4060_v1 }
  0x93   : > { %3052 = vmatpush3.msra.mxu1 %v5720_v61  ;;  %3026 = vmatprep.subr.mxu0 %v4077_v37 }
  0x94   : > { %3053 = vmatprep.subr.mxu1 %v5721_v39  ;;  %3027 = vmatpush3.msra.mxu0 %v4087_v14  ;;  %v5726_v14 = vand.u32 4294901760, %v3715_v23  ;;  %v5733_v23 = vand.u32 4294901760, %v3757_v40  ;;  %v5739_v40 = vand.u32 4294901760, %v3820_v8  ;;  %v255_v8 = vld [vmem:[#allocation2 + $0x178] sm:$0xff] }
  0x95   : > { %3054 = vmatpush3.msra.mxu1 %v5722_v56  ;;  %3028 = vmatprep.subr.mxu0 %v4096_v7  ;;  %v5727_v56 = vld [vmem:[#allocation26_spill] sm:$0xff]  ;;  %v5731_v7 = vld [vmem:[#allocation28_spill] sm:$0xff] }
  0x96   : > { %3055 = vmatprep.subr.mxu1 %v5723_v12  ;;  %3029 = vmatpush3.msra.mxu0 %v4103_v46  ;;  %v5728_v12 = vand.u32 4294901760, %v3721_v25  ;;  %v5729_v46 = vld [vmem:[#allocation27_spill] sm:$0xff]  ;;  %v5734_v25 = vand.u32 4294901760, %v3771_v45  ;;  %v5740_v45 = vand.u32 4294901760, %v3831_v42  ;;  %v5744_v42 = vand.u32 4294901760, %v3890_v54  ;;  %v253_v54 = vld [vmem:[#allocation2 + $0x168] sm:$0xff] }
  0x97   : > { %3056 = vmatpush3.msra.mxu1 %v3899_v62  ;;  %779 = vmatmul.mubr.f32.vlgmr.msra.gmra.mxu0 %v4049_v2  ;;  %v5730_v62 = vand.u32 4294901760, %v3735_v31  ;;  %v5735_v31 = vand.u32 4294901760, %v4037_v28  ;;  %v4246_v28 = vand.u32 4294901760, %v253_v54 }
  0x98   : > { %3057 = vmatprep.subr.mxu1 %v3913_v19  ;;  %3068 = vmatprep.subr.mxu0 %v5724_v33  ;;  %v5753_v33 = vand.u32 4294901760, %v3983_v50 }
  0x99   : > { %3058 = vmatpush3.msra.mxu1 %v5725_v38  ;;  %3069 = vmatpush3.msra.mxu0 %v5726_v14  ;;  %v5738_v14 = vand.u32 4294901760, %v3809_v0  ;;  %v5742_v0 = vand.u32 4294901760, %v3857_v57  ;;  %v270_v57 = vld [vmem:[#allocation2 + $0x1f0] sm:$0xff]  ;;  %5750 = vst [vmem:[#allocation11_spill] sm:$0xff] %v4246_v28  ;;  %v4274_v50 = vsub.f32 %v253_v54, %v4246_v28  ;;  %v5772_v54 = vld [vmem:[#allocation23_spill] sm:$0xff] }
  0x9a   : > { %3059 = vmatprep.subr.mxu1 %v5727_v56  ;;  %3070 = vmatprep.subr.mxu0 %v5728_v12 }
  0x9b   : > { %3060 = vmatpush3.msra.mxu1 %v5729_v46  ;;  %3071 = vmatpush3.msra.mxu0 %v5730_v62  ;;  %v5736_v62 = vand.u32 4294901760, %v3797_v59  ;;  %v5741_v59 = vand.u32 4294901760, %v3843_v48 }
  0x9c   : > { %3061 = vmatprep.subr.mxu1 %v5731_v7  ;;  %3072 = vmatprep.subr.mxu0 %v5732_v18  ;;  %v251_v18 = vld [vmem:[#allocation2 + $0x158] sm:$0xff] }
  0x9d   : > { %3062 = vmatpush3.msra.mxu1 %v3979_v41  ;;  %3073 = vmatpush3.msra.mxu0 %v5733_v23 }
  0x9e   : > { %3063 = vmatprep.subr.mxu1 %v3993_v52  ;;  %3074 = vmatprep.subr.mxu0 %v5734_v25  ;;  %v250_v25 = vld [vmem:[#allocation2 + $0x150] sm:$0xff] }
  0x9f   : > { %3064 = vmatpush3.msra.mxu1 %v4011_v24  ;;  %883 = vmatprep.mubr.f32.mxu1 %v5735_v31  ;;  %v5758_v31 = vand.u32 4294901760, %v4041_v43  ;;  %v5763_v43 = vand.u32 4294901760, %v4060_v1 }
  0xa0   : > { %3075 = vmatpush3.msra.mxu0 %v5736_v62  ;;  %887 = vmatmul.mubr.f32.vlgmr.msra.gmra.mxu1 %v5737_v35  ;;  %v266_v35 = vld [vmem:[#allocation2 + $0x1d0] sm:$0xff] }
  0xa1   : > { %3076 = vmatprep.subr.mxu0 %v5738_v14  ;;  %3103 = vmatprep.subr.mxu1 %v3682_v3  ;;  %v5743_v3 = vand.u32 4294901760, %v3869_v6  ;;  %v5747_v6 = vand.u32 4294901760, %v3934_v58  ;;  %v252_v58 = vld [vmem:[#allocation2 + $0x160] sm:$0xff] }
  0xa2   : > { %3077 = vmatpush3.msra.mxu0 %v5739_v40  ;;  %3104 = vmatpush3.msra.mxu1 %v3684_v4  ;;  %v271_v4 = vld [vmem:[#allocation2 + $0x1f8] sm:$0xff] }
  0xa3   : > { %3078 = vmatprep.subr.mxu0 %v5740_v45  ;;  %3105 = vmatprep.subr.mxu1 %v3686_v5  ;;  %v254_v5 = vld [vmem:[#allocation2 + $0x170] sm:$0xff]  ;;  %v4229_v48 = vand.u32 4294901760, %v271_v4  ;;  %v4301_v45 = vand.u32 4294901760, %v251_v18 }
  0xa4   : > { %3079 = vmatpush3.msra.mxu0 %v5741_v59  ;;  %3106 = vmatpush3.msra.mxu1 %v3688_v9  ;;  %v5745_v9 = vand.u32 4294901760, %v3903_v63  ;;  %v269_v63 = vld [vmem:[#allocation2 + $0x1e8] sm:$0xff]  ;;  %v4307_v59 = vand.u32 4294901760, %v250_v25 }
  0xa5   : > { %3080 = vmatprep.subr.mxu0 %v5742_v0  ;;  %3107 = vmatprep.subr.mxu1 %v3690_v10  ;;  %v5746_v10 = vand.u32 4294901760, %v3921_v55  ;;  %v4244_v55 = vand.u32 4294901760, %v270_v57  ;;  %v4254_v2 = vand.u32 4294901760, %v269_v63  ;;  %5762 = vst [vmem:[#allocation15_spill] sm:$0xff] %v4301_v45  ;;  %v5563_v0 = vand.u32 4294901760, %v4274_v50 }
  0xa6   : > { %3081 = vmatpush3.msra.mxu0 %v5743_v3  ;;  %3108 = vmatpush3.msra.mxu1 %v3692_v11  ;;  %v4231_v11 = vand.u32 4294901760, %v255_v8  ;;  %5764 = vst [vmem:[#allocation16_spill] sm:$0xff] %v4307_v59 }
  0xa7   : > { %3082 = vmatprep.subr.mxu0 %v5744_v42  ;;  %3109 = vmatprep.subr.mxu1 %v3695_v15  ;;  %v4236_v15 = vand.u32 4294901760, %v254_v5  ;;  %5752 = vst [vmem:[#allocation12_spill] sm:$0xff] %v4254_v2  ;;  %v4277_v23 = vsub.f32 %v270_v57, %v4244_v55  ;;  %v5767_v42 = vld [vmem:[#allocation32_spill] sm:$0xff] }
  0xa8   : > { %3083 = vmatpush3.msra.mxu0 %v5745_v9  ;;  %3110 = vmatpush3.msra.mxu1 %v3697_v16  ;;  %v5748_v16 = vand.u32 4294901760, %v3946_v60  ;;  %v4252_v60 = vsub.f32 %v255_v8, %v4231_v11 }
  0xa9   : > { %3084 = vmatprep.subr.mxu0 %v5746_v10  ;;  %3111 = vmatprep.subr.mxu1 %v3699_v17  ;;  %v5749_v17 = vand.u32 4294901760, %v3957_v27  ;;  %v4257_v27 = vsub.f32 %v271_v4, %v4229_v48  ;;  %v4263_v12 = vsub.f32 %v254_v5, %v4236_v15  ;;  %v265_v4 = vld [vmem:[#allocation2 + $0x1c8] sm:$0xff]  ;;  %v5769_v5 = vld [vmem:[#allocation22_spill] sm:$0xff]  ;;  %v5770_v10 = vld [vmem:[#allocation33_spill] sm:$0xff] }
  0xaa   : > { %3085 = vmatpush3.msra.mxu0 %v5747_v6  ;;  %3112 = vmatpush3.msra.mxu1 %v3712_v22  ;;  %v5751_v22 = vand.u32 4294901760, %v5712_v51  ;;  %v4268_v51 = vand.u32 4294901760, %v252_v58  ;;  %v5771_v57 = vand.u32 4294901760, %v5770_v10  ;;  %v4341_v6 = vsub.f32 %v251_v18, %v4301_v45 }
  0xab   : > { %3086 = vmatprep.subr.mxu0 %v5748_v16  ;;  %3113 = vmatprep.subr.mxu1 %v5710_v53  ;;  %v5754_v53 = vand.u32 4294901760, %v4003_v21  ;;  %v5757_v21 = vand.u32 4294901760, %v4028_v32  ;;  %v5565_v32 = vand.u32 4294901760, %v4263_v12  ;;  %v264_v16 = vld [vmem:[#allocation2 + $0x1c0] sm:$0xff]  ;;  %v4358_v18 = vsub.f32 %v250_v25, %v4307_v59 }
  0xac   : > { %3087 = vmatpush3.msra.mxu0 %v5749_v17  ;;  %3114 = vmatpush3.msra.mxu1 %v5711_v29  ;;  %v268_v29 = vld [vmem:[#allocation2 + $0x1e0] sm:$0xff]  ;;  %5755 = vst [vmem:[#allocation29_spill] sm:$0xff] %v4268_v51  ;;  %v4297_v14 = vsub.f32 %v252_v58, %v4268_v51 }
  0xad   : > { %3088 = vmatprep.subr.mxu0 %v5751_v22  ;;  %3115 = vmatprep.subr.mxu1 %v5713_v20  ;;  %v5756_v20 = vand.u32 4294901760, %v4015_v13  ;;  %v5568_v13 = vand.u32 4294901760, %v4252_v60  ;;  %v4290_v62 = vand.u32 4294901760, %v268_v29  ;;  %v248_v17 = vld [vmem:[#allocation2 + $0x140] sm:$0xff] }
  0xae   : > { %3089 = vmatpush3.msra.mxu0 %v5753_v33  ;;  %3116 = vmatpush3.msra.mxu1 %v5714_v49  ;;  %v267_v49 = vld [vmem:[#allocation2 + $0x1d8] sm:$0xff]  ;;  %v5566_v58 = vand.u32 4294901760, %v4297_v14 }
  0xaf   : > { %3090 = vmatprep.subr.mxu0 %v5754_v53  ;;  %3117 = vmatprep.subr.mxu1 %v5715_v30  ;;  %v5569_v30 = vand.u32 4294901760, %v4257_v27  ;;  %5759 = vst [vmem:[#allocation13_spill] sm:$0xff] %v4290_v62  ;;  %v4299_v40 = vand.u32 4294901760, %v267_v49  ;;  %v4321_v1 = vsub.f32 %v4252_v60, %v5568_v13  ;;  %v4335_v9 = vsub.f32 %v268_v29, %v4290_v62  ;;  %v5774_v33 = vld [vmem:[#allocation34_spill] sm:$0xff] }
  0xb0   : > { %3091 = vmatpush3.msra.mxu0 %v5756_v20  ;;  %3118 = vmatpush3.msra.mxu1 %v5716_v34  ;;  %v4285_v34 = vsub.f32 %v269_v63, %v4254_v2  ;;  %v5775_v53 = vand.u32 4294901760, %v5774_v33  ;;  %v5776_v29 = vld [vmem:[#allocation30_spill] sm:$0xff] }
  0xb1   : > { %3092 = vmatprep.subr.mxu0 %v5757_v21  ;;  %3119 = vmatprep.subr.mxu1 %v5717_v44  ;;  %v5760_v44 = vand.u32 4294901760, %v4053_v36  ;;  %5761 = vst [vmem:[#allocation14_spill] sm:$0xff] %v4299_v40  ;;  %v249_v36 = vld [vmem:[#allocation2 + $0x148] sm:$0xff]  ;;  %v4316_v3 = vsub.f32 %v4257_v27, %v5569_v30  ;;  %v4347_v22 = vsub.f32 %v267_v49, %v4299_v40  ;;  %v4360_v21 = vand.u32 4294901760, %v265_v4  ;;  %v247_v33 = vld [vmem:[#allocation2 + $0x138] sm:$0xff] }
  0xb2   : > { %3093 = vmatpush3.msra.mxu0 %v5758_v31  ;;  %3120 = vmatpush3.msra.mxu1 %v5718_v26  ;;  %v5567_v26 = vand.u32 4294901760, %v4277_v23  ;;  %v5564_v8 = vand.u32 4294901760, %v4285_v34  ;;  %v4343_v63 = vand.u32 4294901760, %v249_v36  ;;  %v4365_v49 = vsub.f32 %v4274_v50, %v5563_v0  ;;  %v5778_v31 = vld [vmem:[#allocation24_spill] sm:$0xff]  ;;  %v246_v0 = vld [vmem:[#allocation2 + $0x130] sm:$0xff] }
  0xb3   : > { %3094 = vmatprep.subr.mxu0 %v5760_v44  ;;  %3121 = vmatprep.subr.mxu1 %v5719_v47  ;;  %v5765_v47 = vand.u32 4294901760, %v4077_v37  ;;  %v5768_v37 = vand.u32 4294901760, %v5767_v42  ;;  %5777 = vst [vmem:[#allocation19_spill] sm:$0xff] %v4360_v21  ;;  %v5779_v44 = vld [vmem:[#allocation31_spill] sm:$0xff]  ;;  %v5570_v10 = vand.u32 4294901760, %v4335_v9  ;;  %v4414_v13 = vand.u32 4294901760, %v247_v33 }
  0xb4   : > { %3095 = vmatpush3.msra.mxu0 %v5763_v43  ;;  %3122 = vmatpush3.msra.mxu1 %v5720_v61  ;;  %v4323_v61 = vand.u32 4294901760, %v266_v35  ;;  %5773 = vst [vmem:[#allocation18_spill] sm:$0xff] %v4343_v63  ;;  %v4355_v20 = vsub.f32 %v4277_v23, %v5567_v26  ;;  %v4374_v25 = vsub.f32 %v4285_v34, %v5564_v8  ;;  %v245_v30 = vld [vmem:[#allocation2 + $0x128] sm:$0xff]  ;;  %v4427_v8 = vand.u32 4294901760, %v246_v0  ;;  %v260_v43 = vld [vmem:[#allocation2 + $0x1a0] sm:$0xff] }
  0xb5   : > { %3096 = vmatprep.subr.mxu0 %v5765_v47  ;;  %3123 = vmatprep.subr.mxu1 %v5721_v39  ;;  %v4332_v39 = vsub.f32 %v4263_v12, %v5565_v32  ;;  %v5573_v32 = vand.u32 4294901760, %v4358_v18  ;;  %5784 = vst [vmem:[#allocation27_spill] sm:$0xff] %v4414_v13  ;;  %v4456_v47 = vand.u32 4294901760, %v245_v30 }
  0xb6   : > { %5766 = vst [vmem:[#allocation17_spill] sm:$0xff] %v4323_v61  ;;  %3097 = vmatpush3.msra.mxu0 %v5768_v37  ;;  %3124 = vmatpush3.msra.mxu1 %v5769_v5  ;;  %v4377_v42 = vsub.f32 %v266_v35, %v4323_v61  ;;  %v4382_v5 = vand.u32 4294901760, %v264_v16  ;;  %v4390_v35 = vsub.f32 %v249_v36, %v4343_v63  ;;  %v4403_v36 = vld [vmem:[#allocation2 + $0x1b0] sm:$0xff]  ;;  %5786 = vst [vmem:[#allocation32_spill] sm:$0xff] %v4427_v8  ;;  %v244_v37 = vld [vmem:[#allocation2 + $0x120] sm:$0xff] }
  0xb7   : > { %3098 = vmatprep.subr.mxu0 %v5771_v57  ;;  %3125 = vmatprep.subr.mxu1 %v5772_v54  ;;  %v4385_v57 = vand.u32 4294901760, %v248_v17  ;;  %v263_v54 = vld [vmem:[#allocation2 + $0x1b8] sm:$0xff]  ;;  %5789 = vst [vmem:[#allocation23_spill] sm:$0xff] %v4456_v47 }
  0xb8   : > { %3099 = vmatpush3.msra.mxu0 %v5775_v53  ;;  %1053 = vmatprep.mubr.f32.mxu0 %v5776_v29  ;;  %5780 = vst [vmem:[#allocation20_spill] sm:$0xff] %v4382_v5  ;;  %5782 = vst [vmem:[#allocation25_spill] sm:$0xff] %v4390_v35  ;;  %v5571_v53 = vand.u32 4294901760, %v4347_v22  ;;  %v4430_v26 = vsub.f32 %v264_v16, %v4382_v5  ;;  %v4446_v16 = vand.u32 4294901760, %v4403_v36 }
  0xb9   : > { %3126 = vmatpush3.msra.mxu1 %v5778_v31  ;;  %1055 = vmatmul.mubr.f32.vlgmr.msra.gmra.mxu0 %v5779_v44  ;;  %5781 = vst [vmem:[#allocation21_spill] sm:$0xff] %v4385_v57  ;;  %v5572_v31 = vand.u32 4294901760, %v4341_v6 }
  0xba   : > { %3127 = vmatprep.subr.mxu1 %v3913_v19  ;;  %3138 = vmatprep.subr.mxu0 %v4229_v48  ;;  %v4395_v19 = vsub.f32 %v4297_v14, %v5566_v58  ;;  %v4407_v58 = vsub.f32 %v265_v4, %v4360_v21  ;;  %v4422_v4 = vsub.f32 %v4335_v9, %v5570_v10 }
  0xbb   : > { %3128 = vmatpush3.msra.mxu1 %v5725_v38  ;;  %3139 = vmatpush3.msra.mxu0 %v4231_v11  ;;  %v1400_v38 = vand.u32 4294901760, %v4355_v20  ;;  %v5576_v20 = vand.u32 4294901760, %v4377_v42  ;;  %5787 = vst [vmem:[#allocation22_spill] sm:$0xff] %v4430_v26  ;;  %v4438_v10 = vsub.f32 %v4347_v22, %v5571_v53  ;;  %5788 = vst [vmem:[#allocation33_spill] sm:$0xff] %v4446_v16 }
  0xbc   : > { %3129 = vmatprep.subr.mxu1 %v5727_v56  ;;  %3140 = vmatprep.subr.mxu0 %v4244_v55  ;;  %v4412_v56 = vand.u32 4294901760, %v263_v54 }
  0xbd   : > { %3130 = vmatpush3.msra.mxu1 %v5729_v46  ;;  %3141 = vmatpush3.msra.mxu0 %v4236_v15  ;;  %v4425_v46 = vsub.f32 %v248_v17, %v4385_v57  ;;  %v4443_v17 = vsub.f32 %v4341_v6, %v5572_v31  ;;  %v5792_v31 = vand.u32 4294901760, %v4316_v3  ;;  %v5795_v3 = vand.u32 4294901760, %v4407_v58 }
  0xbe   : > { %5783 = vst [vmem:[#allocation26_spill] sm:$0xff] %v4412_v56  ;;  %3131 = vmatprep.subr.mxu1 %v5731_v7  ;;  %3142 = vmatprep.subr.mxu0 %v4254_v2  ;;  %v261_v7 = vld [vmem:[#allocation2 + $0x1a8] sm:$0xff]  ;;  %v4472_v53 = vsub.f32 %v263_v54, %v4412_v56  ;;  %v1421_v54 = vand.u32 4294901760, %v4438_v10  ;;  %v4502_v10 = vsub.f32 %v245_v30, %v4456_v47  ;;  %v242_v2 = vld [vmem:[#allocation2 + $0x110] sm:$0xff] }
  0xbf   : > { %5785 = vst [vmem:[#allocation28_spill] sm:$0xff] %v4425_v46  ;;  %3132 = vmatpush3.msra.mxu1 %v3979_v41  ;;  %3143 = vmatpush3.msra.mxu0 %v4246_v28  ;;  %v4453_v41 = vsub.f32 %v4358_v18, %v5573_v32  ;;  %v4467_v32 = vsub.f32 %v4377_v42, %v5576_v20  ;;  %v205_v28 = vld [vmem:[%s3676_s10 + $0x18] sm:$0xff]  ;;  %v5794_v20 = vand.u32 4294901760, %v4321_v1 }
  0xc0   : > { %3133 = vmatprep.subr.mxu1 %v3993_v52  ;;  %3144 = vmatprep.subr.mxu0 %v4290_v62  ;;  %v4462_v52 = vsub.f32 %v247_v33, %v4414_v13  ;;  %v4469_v62 = vand.u32 4294901760, %v244_v37  ;;  %5791 = vst [vmem:[#allocation30_spill] sm:$0xff] %v4472_v53  ;;  %v4518_v30 = vsub.f32 %v4403_v36, %v4446_v16  ;;  %v4535_v36 = vand.u32 4294901760, %v205_v28 }
  0xc1   : > { %3134 = vmatpush3.msra.mxu1 %v4011_v24  ;;  %1157 = vmatprep.mubr.f32.mxu1 %v5776_v29  ;;  %v1414_v24 = vand.u32 4294901760, %v4422_v4  ;;  %v4478_v29 = vsub.f32 %v246_v0, %v4427_v8  ;;  %v4489_v4 = vand.u32 4294901760, %v260_v43  ;;  %v243_v0 = vld [vmem:[#allocation2 + $0x118] sm:$0xff]  ;;  %v1428_v1 = vand.u32 4294901760, %v4467_v32 }
  0xc2   : > { %5790 = vst [vmem:[#allocation34_spill] sm:$0xff] %v4469_v62  ;;  %3145 = vmatpush3.msra.mxu0 %v4268_v51  ;;  %1159 = vmatmul.mubr.f32.vlgmr.msra.gmra.mxu1 %v5779_v44  ;;  %v1309_v51 = vand.u32 4294901760, %v4443_v17  ;;  %v4487_v44 = vand.u32 4294901760, %v261_v7  ;;  %v5796_v17 = vand.u32 4294901760, %v4390_v35  ;;  %v5800_v32 = vand.u32 4294901760, %v4425_v46  ;;  %5801 = vst [vmem:[#allocation35_spill] sm:$0xff] %v4535_v36 }
  0xc3   : > { %3146 = vmatprep.subr.mxu0 %v4299_v40  ;;  %3173 = vmatprep.subr.mxu1 %v5792_v31  ;;  %v4499_v31 = vsub.f32 %v4407_v58, %v5795_v3  ;;  %v259_v3 = vld [vmem:[#allocation2 + $0x198] sm:$0xff]  ;;  %v4533_v33 = vand.u32 4294901760, %v243_v0 }
  0xc4   : > { %5793 = vst [vmem:[#allocation24_spill] sm:$0xff] %v4487_v44  ;;  %3147 = vmatpush3.msra.mxu0 %v4301_v45  ;;  %3174 = vmatpush3.msra.mxu1 %v5794_v20  ;;  %v4507_v40 = vsub.f32 %v4390_v35, %v5796_v17  ;;  %v204_v45 = vld [vmem:[%s3676_s10 + $0x10] sm:$0xff]  ;;  %v4513_v20 = vsub.f32 %v244_v37, %v4469_v62  ;;  %v5798_v17 = vand.u32 4294901760, %v4332_v39  ;;  %v5802_v39 = vand.u32 4294901760, %v4374_v25 }
  0xc5   : > { %3148 = vmatprep.subr.mxu0 %v4323_v61  ;;  %3175 = vmatprep.subr.mxu1 %v1400_v38  ;;  %v5799_v61 = vand.u32 4294901760, %v4430_v26  ;;  %v4531_v37 = vsub.f32 %v4425_v46, %v5800_v32  ;;  %v258_v35 = vld [vmem:[#allocation2 + $0x190] sm:$0xff]  ;;  %v5804_v32 = vand.u32 4294901760, %v4365_v49  ;;  %v1435_v46 = vand.u32 4294901760, %v4499_v31 }
  0xc6   : > { %5797 = vst [vmem:[#allocation31_spill] sm:$0xff] %v4513_v20  ;;  %3149 = vmatpush3.msra.mxu0 %v4307_v59  ;;  %3176 = vmatpush3.msra.mxu1 %v5798_v17  ;;  %v4541_v59 = vand.u32 4294901760, %v242_v2  ;;  %v4553_v25 = vand.u32 4294901760, %v259_v3  ;;  %v4566_v31 = vsub.f32 %v260_v43, %v4489_v4  ;;  %v5808_v43 = vand.u32 4294901760, %v4462_v52 }
  0xc7   : > { %v4526_v38 = vsub.f32 %v4430_v26, %v5799_v61  ;;  %3150 = vmatprep.subr.mxu0 %v4360_v21  ;;  %3177 = vmatprep.subr.mxu1 %v5802_v39  ;;  %v4544_v61 = vsub.f32 %v261_v7, %v4487_v44  ;;  %v4546_v26 = vand.u32 4294901760, %v204_v45  ;;  %v1323_v21 = vand.u32 4294901760, %v4507_v40 }
  0xc8   : > { %3151 = vmatpush3.msra.mxu0 %v4343_v63  ;;  %3178 = vmatpush3.msra.mxu1 %v5804_v32  ;;  %v5805_v7 = vand.u32 4294901760, %v4472_v53  ;;  %v4562_v63 = vand.u32 4294901760, %v258_v35  ;;  %v257_v32 = vld [vmem:[#allocation2 + $0x188] sm:$0xff]  ;;  %v5807_v40 = vand.u32 4294901760, %v4395_v19  ;;  %v1330_v39 = vand.u32 4294901760, %v4531_v37  ;;  %v256_v37 = vld [vmem:[#allocation2 + $0x180] sm:$0xff] }
  0xc9   : > { %5803 = vst [vmem:[#allocation36_spill] sm:$0xff] %v4546_v26  ;;  %3152 = vmatprep.subr.mxu0 %v4382_v5  ;;  %3179 = vmatprep.subr.mxu1 %v1414_v24  ;;  %v1442_v24 = vand.u32 4294901760, %v4526_v38  ;;  %v241_v5 = vld [vmem:[#allocation2 + $0x108] sm:$0xff]  ;;  %v1336_v49 = vsub.f32 %v4462_v52, %v5808_v43  ;;  %v4584_v19 = vsub.f32 %v242_v2, %v4541_v59  ;;  %v5810_v38 = vand.u32 4294901760, %v4518_v30 }
  0xca   : > { %v4560_v17 = vsub.f32 %v4472_v53, %v5805_v7  ;;  %5806 = vst [vmem:[#allocation37_spill] sm:$0xff] %v4562_v63  ;;  %3153 = vmatpush3.msra.mxu0 %v4385_v57  ;;  %3180 = vmatpush3.msra.mxu1 %v5807_v40  ;;  %v4574_v7 = vsub.f32 %v243_v0, %v4533_v33  ;;  %v240_v40 = vld [vmem:[#allocation2 + $0x100] sm:$0xff]  ;;  %v5811_v43 = vand.u32 4294901760, %v4453_v41  ;;  %v5617_v41 = vand.u32 4294901760, %v4513_v20 }
  0xcb   : > { %v4577_v53 = vsub.f32 %v205_v28, %v4535_v36  ;;  %3154 = vmatprep.subr.mxu0 %v4412_v56  ;;  %3181 = vmatprep.subr.mxu1 %v1421_v54  ;;  %v4588_v0 = vsub.f32 %v204_v45, %v4546_v26  ;;  %v5809_v28 = vand.u32 4294901760, %v4478_v29  ;;  %v4594_v56 = vand.u32 4294901760, %v257_v32 }
  0xcc   : > { %3155 = vmatpush3.msra.mxu0 %v4414_v13  ;;  %3182 = vmatpush3.msra.mxu1 %v1309_v51  ;;  %v4598_v2 = vsub.f32 %v259_v3, %v4553_v25  ;;  %v1449_v45 = vand.u32 4294901760, %v4560_v17  ;;  %v1455_v51 = vsub.f32 %v4518_v30, %v5810_v38  ;;  %v4605_v13 = vand.u32 4294901760, %v241_v5 }
  0xcd   : > { %v1343_v54 = vsub.f32 %v4478_v29, %v5809_v28  ;;  %3156 = vmatprep.subr.mxu0 %v4446_v16  ;;  %3183 = vmatprep.subr.mxu1 %v1428_v1  ;;  %v4611_v3 = vand.u32 4294901760, %v256_v37  ;;  %v4613_v57 = vand.u32 4294901760, %v240_v40  ;;  %v4617_v17 = vsub.f32 %v258_v35, %v4562_v63 }
  0xce   : > { %3157 = vmatpush3.msra.mxu0 %v4427_v8  ;;  %3184 = vmatpush3.msra.mxu1 %v5811_v43  ;;  %v1337_v38 = vand.u32 4294901760, %v1336_v49  ;;  %v5812_v28 = vand.u32 4294901760, %v4544_v61  ;;  %v5813_v1 = vand.u32 4294901760, %v4502_v10  ;;  %v1456_v49 = vand.u32 4294901760, %v1455_v51 }
  0xcf   : > { %3158 = vmatprep.subr.mxu0 %v4487_v44  ;;  %3185 = vmatprep.subr.mxu1 %v1435_v46  ;;  %v1344_v16 = vand.u32 4294901760, %v1343_v54  ;;  %v4631_v46 = vsub.f32 %v257_v32, %v4594_v56  ;;  %v5814_v43 = vand.u32 4294901760, %v4566_v31  ;;  %v5816_v32 = vand.u32 4294901760, %v4577_v53 }
  0xd0   : > { %v1462_v8 = vsub.f32 %v4544_v61, %v5812_v28  ;;  %3159 = vmatpush3.msra.mxu0 %v4456_v47  ;;  %3186 = vmatpush3.msra.mxu1 %v1323_v21  ;;  %v1350_v35 = vsub.f32 %v4502_v10, %v5813_v1  ;;  %v4635_v28 = vsub.f32 %v241_v5, %v4605_v13 }
  0xd1   : > { %3160 = vmatprep.subr.mxu0 %v4489_v4  ;;  %3187 = vmatprep.subr.mxu1 %v1442_v24  ;;  %v1469_v21 = vsub.f32 %v4566_v31, %v5814_v43  ;;  %v4643_v1 = vsub.f32 %v240_v40, %v4613_v57  ;;  %v1263_v24 = vsub.f32 %v4577_v53, %v5816_v32  ;;  %v5818_v40 = vand.u32 4294901760, %v4588_v0 }
  0xd2   : > { %3161 = vmatpush3.msra.mxu0 %v4469_v62  ;;  %3188 = vmatpush3.msra.mxu1 %v1330_v39  ;;  %v4650_v5 = vsub.f32 %v256_v37, %v4611_v3  ;;  %v1463_v43 = vand.u32 4294901760, %v1462_v8  ;;  %v1357_v39 = vsub.f32 %v4513_v20, %v5617_v41  ;;  %v1351_v32 = vand.u32 4294901760, %v1350_v35 }
  0xd3   : > { %5815 = vst [vmem:[#allocation38_spill] sm:$0xff] %v4643_v1  ;;  %3162 = vmatprep.subr.mxu0 %v4553_v25  ;;  %3189 = vmatprep.subr.mxu1 %v1449_v45  ;;  %v1269_v54 = vsub.f32 %v4588_v0, %v5818_v40  ;;  %v5819_v37 = vand.u32 4294901760, %v4598_v2  ;;  %v1470_v45 = vand.u32 4294901760, %v1469_v21  ;;  %v5820_v41 = vand.u32 4294901760, %v4574_v7 }
  0xd4   : > { %5817 = vst [vmem:[#allocation39_spill] sm:$0xff] %v4650_v5  ;;  %3163 = vmatpush3.msra.mxu0 %v4533_v33  ;;  %3190 = vmatpush3.msra.mxu1 %v1337_v38  ;;  %v1264_v38 = vand.u32 4294901760, %v1263_v24  ;;  %v5821_v35 = vand.u32 4294901760, %v4617_v17  ;;  %v5621_v8 = vand.u32 4294901760, %v4650_v5  ;;  %v5620_v44 = vand.u32 4294901760, %v4643_v1 }
  0xd5   : > { %v1476_v51 = vsub.f32 %v4598_v2, %v5819_v37  ;;  %3164 = vmatprep.subr.mxu0 %v4562_v63  ;;  %3191 = vmatprep.subr.mxu1 %v1456_v49  ;;  %v1364_v40 = vsub.f32 %v4574_v7, %v5820_v41  ;;  %v1358_v49 = vand.u32 4294901760, %v1357_v39  ;;  %v1270_v21 = vand.u32 4294901760, %v1269_v54 }
  0xd6   : > { %3165 = vmatpush3.msra.mxu0 %v4541_v59  ;;  %3192 = vmatpush3.msra.mxu1 %v1344_v16  ;;  %v1483_v37 = vsub.f32 %v4617_v17, %v5821_v35  ;;  %v5822_v63 = vand.u32 4294901760, %v4584_v19  ;;  %v5823_v24 = vand.u32 4294901760, %v4631_v46  ;;  %v5824_v54 = vand.u32 4294901760, %v4635_v28 }
  0xd7   : > { %3166 = vmatprep.subr.mxu0 %v4594_v56  ;;  %3193 = vmatprep.subr.mxu1 %v1463_v43  ;;  %v1477_v16 = vand.u32 4294901760, %v1476_v51  ;;  %v1365_v43 = vand.u32 4294901760, %v1364_v40  ;;  %v1497_v51 = vsub.f32 %v4650_v5, %v5621_v8  ;;  %v5842_v8 = vld [vmem:[#allocation27_spill] sm:$0xff] }
  0xd8   : > { %v1371_v41 = vsub.f32 %v4584_v19, %v5822_v63  ;;  %3167 = vmatpush3.msra.mxu0 %v4605_v13  ;;  %3194 = vmatpush3.msra.mxu1 %v1351_v32  ;;  %v1490_v35 = vsub.f32 %v4631_v46, %v5823_v24  ;;  %v1378_v39 = vsub.f32 %v4635_v28, %v5824_v54  ;;  %v1484_v63 = vand.u32 4294901760, %v1483_v37  ;;  %v5828_v24 = vld [vmem:[#allocation22_spill] sm:$0xff]  ;;  %v5831_v54 = vld [vmem:[#allocation29_spill] sm:$0xff] }
  0xd9   : > { %3168 = vmatprep.subr.mxu0 %v4611_v3  ;;  %3195 = vmatprep.subr.mxu1 %v1470_v45  ;;  %v1385_v45 = vsub.f32 %v4643_v1, %v5620_v44  ;;  %v1498_v37 = vand.u32 4294901760, %v1497_v51  ;;  %v5834_v51 = vld [vmem:[#allocation15_spill] sm:$0xff]  ;;  %v5841_v44 = vld [vmem:[#allocation26_spill] sm:$0xff] }
  0xda   : > { %3169 = vmatpush3.msra.mxu0 %v4613_v57  ;;  %1265 = vmatprep.mubr.f32.mxu0 %v1264_v38  ;;  %v1372_v32 = vand.u32 4294901760, %v1371_v41  ;;  %v1491_v40 = vand.u32 4294901760, %v1490_v35  ;;  %v1379_v38 = vand.u32 4294901760, %v1378_v39  ;;  %v5826_v41 = vld [vmem:[#allocation25_spill] sm:$0xff]  ;;  %v5832_v39 = vld [vmem:[#allocation30_spill] sm:$0xff] }
  0xdb   : > { %3196 = vmatpush3.msra.mxu1 %v1358_v49  ;;  %1271 = vmatmul.mubr.f32.vlgmr.msra.gmra.mxu0 %v1270_v21  ;;  %v1386_v49 = vand.u32 4294901760, %v1385_v45  ;;  %v5825_v21 = vld [vmem:[#allocation12_spill] sm:$0xff]  ;;  %v5829_v35 = vld [vmem:[#allocation13_spill] sm:$0xff] }
  0xdc   : > { %3197 = vmatprep.subr.mxu1 %v1477_v16  ;;  %3208 = vmatprep.subr.mxu0 %v4257_v27  ;;  %v5827_v16 = vld [vmem:[#allocation11_spill] sm:$0xff]  ;;  %v5836_v45 = vld [vmem:[#allocation16_spill] sm:$0xff] }
  0xdd   : > { %3198 = vmatpush3.msra.mxu1 %v1365_v43  ;;  %3209 = vmatpush3.msra.mxu0 %v4252_v60  ;;  %v5830_v43 = vld [vmem:[#allocation28_spill] sm:$0xff] }
  0xde   : > { %3199 = vmatprep.subr.mxu1 %v1484_v63  ;;  %3210 = vmatprep.subr.mxu0 %v4277_v23  ;;  %v5833_v63 = vld [vmem:[#allocation14_spill] sm:$0xff] }
  0xdf   : > { %3200 = vmatpush3.msra.mxu1 %v1372_v32  ;;  %3211 = vmatpush3.msra.mxu0 %v4263_v12  ;;  %v5835_v32 = vld [vmem:[#allocation17_spill] sm:$0xff] }
  0xe0   : > { %3201 = vmatprep.subr.mxu1 %v1491_v40  ;;  %3212 = vmatprep.subr.mxu0 %v4285_v34  ;;  %v5837_v40 = vld [vmem:[#allocation19_spill] sm:$0xff] }
  0xe1   : > { %3202 = vmatpush3.msra.mxu1 %v1379_v38  ;;  %3213 = vmatpush3.msra.mxu0 %v4274_v50  ;;  %v5838_v38 = vld [vmem:[#allocation18_spill] sm:$0xff] }
  0xe2   : > { %3203 = vmatprep.subr.mxu1 %v1498_v37  ;;  %3214 = vmatprep.subr.mxu0 %v4335_v9  ;;  %v5839_v37 = vld [vmem:[#allocation20_spill] sm:$0xff] }
  0xe3   : > { %3204 = vmatpush3.msra.mxu1 %v1386_v49  ;;  %1501 = vmatprep.mubr.f32.mxu1 %v4535_v36  ;;  %v5840_v49 = vld [vmem:[#allocation21_spill] sm:$0xff]  ;;  %v5844_v36 = vld [vmem:[#allocation32_spill] sm:$0xff] }
  0xe4   : > { %3215 = vmatpush3.msra.mxu0 %v4297_v14  ;;  %1503 = vmatmul.mubr.f32.vlgmr.msra.gmra.mxu1 %v4546_v26  ;;  %v5843_v26 = vld [vmem:[#allocation33_spill] sm:$0xff] }
  0xe5   : > { %3216 = vmatprep.subr.mxu0 %v4347_v22  ;;  %3243 = vmatprep.subr.mxu1 %v4229_v48 }
  0xe6   : > { %3217 = vmatpush3.msra.mxu0 %v4341_v6  ;;  %3244 = vmatpush3.msra.mxu1 %v4231_v11 }
  0xe7   : > { %3218 = vmatprep.subr.mxu0 %v4377_v42  ;;  %3245 = vmatprep.subr.mxu1 %v4244_v55 }
  0xe8   : > { %3219 = vmatpush3.msra.mxu0 %v4358_v18  ;;  %3246 = vmatpush3.msra.mxu1 %v4236_v15 }
  0xe9   : > { %3220 = vmatprep.subr.mxu0 %v4407_v58  ;;  %3247 = vmatprep.subr.mxu1 %v5825_v21 }
  0xea   : > { %3221 = vmatpush3.msra.mxu0 %v5826_v41  ;;  %3248 = vmatpush3.msra.mxu1 %v5827_v16 }
  0xeb   : > { %3222 = vmatprep.subr.mxu0 %v5828_v24  ;;  %3249 = vmatprep.subr.mxu1 %v5829_v35 }
  0xec   : > { %3223 = vmatpush3.msra.mxu0 %v5830_v43  ;;  %3250 = vmatpush3.msra.mxu1 %v5831_v54 }
  0xed   : > { %3224 = vmatprep.subr.mxu0 %v5832_v39  ;;  %3251 = vmatprep.subr.mxu1 %v5833_v63 }
  0xee   : > { %3225 = vmatpush3.msra.mxu0 %v4462_v52  ;;  %3252 = vmatpush3.msra.mxu1 %v5834_v51 }
  0xef   : > { %3226 = vmatprep.subr.mxu0 %v4518_v30  ;;  %3253 = vmatprep.subr.mxu1 %v5835_v32 }
  0xf0   : > { %3227 = vmatpush3.msra.mxu0 %v4478_v29  ;;  %3254 = vmatpush3.msra.mxu1 %v5836_v45 }
  0xf1   : > { %3228 = vmatprep.subr.mxu0 %v4544_v61  ;;  %3255 = vmatprep.subr.mxu1 %v5837_v40 }
  0xf2   : > { %3229 = vmatpush3.msra.mxu0 %v4502_v10  ;;  %3256 = vmatpush3.msra.mxu1 %v5838_v38 }
  0xf3   : > { %3230 = vmatprep.subr.mxu0 %v4566_v31  ;;  %3257 = vmatprep.subr.mxu1 %v5839_v37 }
  0xf4   : > { %3231 = vmatpush3.msra.mxu0 %v4513_v20  ;;  %3258 = vmatpush3.msra.mxu1 %v5840_v49  ;;  %v5845_v20 = vld [vmem:[#allocation24_spill] sm:$0xff] }
  0xf5   : > { %3232 = vmatprep.subr.mxu0 %v4598_v2  ;;  %3259 = vmatprep.subr.mxu1 %v5841_v44 }
  0xf6   : > { %3233 = vmatpush3.msra.mxu0 %v4574_v7  ;;  %3260 = vmatpush3.msra.mxu1 %v5842_v8 }
  0xf7   : > { %3234 = vmatprep.subr.mxu0 %v4617_v17  ;;  %3261 = vmatprep.subr.mxu1 %v5843_v26 }
  0xf8   : > { %3235 = vmatpush3.msra.mxu0 %v4584_v19  ;;  %3262 = vmatpush3.msra.mxu1 %v5844_v36 }
  0xf9   : > { %3236 = vmatprep.subr.mxu0 %v4631_v46  ;;  %3263 = vmatprep.subr.mxu1 %v5845_v20  ;;  %v5846_v20 = vand.u32 4294901760, %v4257_v27  ;;  %v5851_v27 = vand.u32 4294901760, %v4285_v34  ;;  %v5856_v34 = vand.u32 4294901760, %v4588_v0 }
  0xfa   : > { %3237 = vmatpush3.msra.mxu0 %v4635_v28  ;;  %3264 = vmatpush3.msra.mxu1 %v4456_v47  ;;  %v5847_v47 = vand.u32 4294901760, %v4252_v60  ;;  %v5852_v60 = vand.u32 4294901760, %v4274_v50  ;;  %v5858_v50 = vand.u32 4294901760, %v4341_v6  ;;  %v5866_v6 = vand.u32 4294901760, %v4462_v52 }
  0xfb   : > { %3238 = vmatprep.subr.mxu0 %v4650_v5  ;;  %3265 = vmatprep.subr.mxu1 %v4489_v4  ;;  %v5848_v5 = vld [vmem:[#allocation37_spill] sm:$0xff]  ;;  %v5870_v52 = vand.u32 4294901760, %v4502_v10  ;;  %v285_v10 = vld [vmem:[#allocation2 + $0x268] sm:$0xff] }
  0xfc   : > { %3239 = vmatpush3.msra.mxu0 %v4643_v1  ;;  %1638 = vmatprep.mubr.f32.mxu0 %v4577_v53  ;;  %v5849_v1 = vand.u32 4294901760, %v4277_v23  ;;  %v5853_v23 = vand.u32 4294901760, %v4335_v9  ;;  %v5859_v9 = vand.u32 4294901760, %v4377_v42  ;;  %v287_v42 = vld [vmem:[#allocation2 + $0x278] sm:$0xff] }
  0xfd   : > { %3266 = vmatpush3.msra.mxu1 %v4469_v62  ;;  %1641 = vmatmul.mubr.f32.vlgmr.msra.gmra.mxu0 %v4588_v0  ;;  %v5850_v62 = vand.u32 4294901760, %v4263_v12  ;;  %v5854_v12 = vand.u32 4294901760, %v4577_v53  ;;  %v5869_v53 = vand.u32 4294901760, %v4544_v61  ;;  %v5872_v0 = vld [vmem:[#allocation31_spill] sm:$0xff]  ;;  %v5874_v61 = vand.u32 4294901760, %v4598_v2 }
  0xfe   : > { %3267 = vmatprep.subr.mxu1 %v4553_v25  ;;  %3278 = vmatprep.subr.mxu0 %v5846_v20  ;;  %v5871_v20 = vand.u32 4294901760, %v4566_v31  ;;  %v284_v2 = vld [vmem:[#allocation2 + $0x260] sm:$0xff] }
  0xff   : > { %3268 = vmatpush3.msra.mxu1 %v4533_v33  ;;  %3279 = vmatpush3.msra.mxu0 %v5847_v47  ;;  %v5857_v47 = vand.u32 4294901760, %v4347_v22  ;;  %v5861_v22 = vand.u32 4294901760, %v4407_v58  ;;  %v5867_v58 = vand.u32 4294901760, %v4518_v30  ;;  %v286_v30 = vld [vmem:[#allocation2 + $0x270] sm:$0xff] }
 0x100   : > { %3269 = vmatprep.subr.mxu1 %v5848_v5  ;;  %3280 = vmatprep.subr.mxu0 %v5849_v1  ;;  %v5873_v1 = vand.u32 4294901760, %v5872_v0  ;;  %v4839_v31 = vand.u32 4294901760, %v286_v30 }
 0x101   : > { %3270 = vmatpush3.msra.mxu1 %v4541_v59  ;;  %3281 = vmatpush3.msra.mxu0 %v5850_v62  ;;  %v5855_v62 = vand.u32 4294901760, %v4297_v14  ;;  %v5860_v14 = vand.u32 4294901760, %v4358_v18  ;;  %v5868_v18 = vand.u32 4294901760, %v4478_v29  ;;  %v4828_v29 = vand.u32 4294901760, %v287_v42 }
 0x102   : > { %3271 = vmatprep.subr.mxu1 %v4594_v56  ;;  %3282 = vmatprep.subr.mxu0 %v5851_v27 }
 0x103   : > { %3272 = vmatpush3.msra.mxu1 %v4605_v13  ;;  %3283 = vmatpush3.msra.mxu0 %v5852_v60 }
 0x104   : > { %3273 = vmatprep.subr.mxu1 %v4611_v3  ;;  %3284 = vmatprep.subr.mxu0 %v5853_v23 }
 0x105   : > { %3274 = vmatpush3.msra.mxu1 %v4613_v57  ;;  %1745 = vmatprep.mubr.f32.mxu1 %v5854_v12  ;;  %v280_v12 = vld [vmem:[#allocation2 + $0x240] sm:$0xff] }
 0x106   : > { %3285 = vmatpush3.msra.mxu0 %v5855_v62  ;;  %1749 = vmatmul.mubr.f32.vlgmr.msra.gmra.mxu1 %v5856_v34 }
 0x107   : > { %3286 = vmatprep.subr.mxu0 %v5857_v47  ;;  %3313 = vmatprep.subr.mxu1 %v4229_v48  ;;  %v5862_v48 = vand.u32 4294901760, %v5826_v41  ;;  %v5876_v41 = vand.u32 4294901760, %v4617_v17  ;;  %v283_v17 = vld [vmem:[#allocation2 + $0x258] sm:$0xff] }
 0x108   : > { %3287 = vmatpush3.msra.mxu0 %v5858_v50  ;;  %3314 = vmatpush3.msra.mxu1 %v4231_v11  ;;  %v5863_v11 = vand.u32 4294901760, %v5828_v24  ;;  %v5877_v24 = vand.u32 4294901760, %v4584_v19  ;;  %v4861_v19 = vand.u32 4294901760, %v284_v2  ;;  %v279_v47 = vld [vmem:[#allocation2 + $0x238] sm:$0xff]  ;;  %v4908_v50 = vand.u32 4294901760, %v280_v12 }
 0x109   : > { %3288 = vmatprep.subr.mxu0 %v5859_v9  ;;  %3315 = vmatprep.subr.mxu1 %v4244_v55  ;;  %v5864_v55 = vand.u32 4294901760, %v5830_v43  ;;  %v4859_v43 = vsub.f32 %v286_v30, %v4839_v31  ;;  %v275_v30 = vld [vmem:[#allocation2 + $0x218] sm:$0xff] }
 0x10a   : > { %3289 = vmatpush3.msra.mxu0 %v5860_v14  ;;  %3316 = vmatpush3.msra.mxu1 %v4236_v15  ;;  %v5865_v15 = vand.u32 4294901760, %v5832_v39  ;;  %v4882_v27 = vsub.f32 %v284_v2, %v4861_v19  ;;  %v278_v14 = vld [vmem:[#allocation2 + $0x230] sm:$0xff]  ;;  %v4966_v2 = vand.u32 4294901760, %v275_v30 }
 0x10b   : > { %3290 = vmatprep.subr.mxu0 %v5861_v22  ;;  %3317 = vmatprep.subr.mxu1 %v5825_v21  ;;  %v5875_v21 = vand.u32 4294901760, %v4574_v7  ;;  %v5878_v7 = vand.u32 4294901760, %v4631_v46  ;;  %v5645_v60 = vand.u32 4294901760, %v4859_v43 }
 0x10c   : > { %3291 = vmatpush3.msra.mxu0 %v5862_v48  ;;  %3318 = vmatpush3.msra.mxu1 %v5827_v16  ;;  %v4845_v16 = vsub.f32 %v287_v42, %v4828_v29  ;;  %v5642_v9 = vand.u32 4294901760, %v4882_v27  ;;  %v4921_v48 = vand.u32 4294901760, %v279_v47 }
 0x10d   : > { %3292 = vmatprep.subr.mxu0 %v5863_v11  ;;  %3319 = vmatprep.subr.mxu1 %v5829_v35  ;;  %v5880_v35 = vand.u32 4294901760, %v4635_v28  ;;  %v5886_v28 = vld [vmem:[#allocation35_spill] sm:$0xff] }
 0x10e   : > { %3293 = vmatpush3.msra.mxu0 %v5864_v55  ;;  %3320 = vmatpush3.msra.mxu1 %v5831_v54  ;;  %v282_v54 = vld [vmem:[#allocation2 + $0x250] sm:$0xff]  ;;  %v5646_v46 = vand.u32 4294901760, %v4845_v16 }
 0x10f   : > { %3294 = vmatprep.subr.mxu0 %v5865_v15  ;;  %3321 = vmatprep.subr.mxu1 %v5833_v63  ;;  %v5884_v63 = vld [vmem:[#allocation38_spill] sm:$0xff]  ;;  %v4930_v15 = vsub.f32 %v280_v12, %v4908_v50 }
 0x110   : > { %3295 = vmatpush3.msra.mxu0 %v5866_v6  ;;  %3322 = vmatpush3.msra.mxu1 %v5834_v51  ;;  %v5885_v51 = vand.u32 4294901760, %v5884_v63  ;;  %v2136_v23 = vsub.f32 %v4845_v16, %v5646_v46  ;;  %v2157_v6 = vsub.f32 %v4882_v27, %v5642_v9 }
 0x111   : > { %3296 = vmatprep.subr.mxu0 %v5867_v58  ;;  %3323 = vmatprep.subr.mxu1 %v5835_v32  ;;  %v4935_v58 = vand.u32 4294901760, %v278_v14 }
 0x112   : > { %3297 = vmatpush3.msra.mxu0 %v5868_v18  ;;  %3324 = vmatpush3.msra.mxu1 %v5836_v45  ;;  %v4873_v45 = vand.u32 4294901760, %v283_v17  ;;  %v276_v18 = vld [vmem:[#allocation2 + $0x220] sm:$0xff] }
 0x113   : > { %3298 = vmatprep.subr.mxu0 %v5869_v53  ;;  %3325 = vmatprep.subr.mxu1 %v5837_v40  ;;  %v5887_v40 = vld [vmem:[#allocation34_spill] sm:$0xff]  ;;  %v4943_v53 = vsub.f32 %v279_v47, %v4921_v48  ;;  %v297_v47 = vld [vmem:[#allocation2 + $0x2c8] sm:$0xff] }
 0x114   : > { %3299 = vmatpush3.msra.mxu0 %v5870_v52  ;;  %3326 = vmatpush3.msra.mxu1 %v5838_v38  ;;  %v5888_v38 = vld [vmem:[#allocation36_spill] sm:$0xff] }
 0x115   : > { %3300 = vmatprep.subr.mxu0 %v5871_v20  ;;  %3327 = vmatprep.subr.mxu1 %v5839_v37  ;;  %v4877_v37 = vand.u32 4294901760, %v282_v54 }
 0x116   : > { %3301 = vmatpush3.msra.mxu0 %v5873_v1  ;;  %3328 = vmatpush3.msra.mxu1 %v5840_v49  ;;  %v281_v49 = vld [vmem:[#allocation2 + $0x248] sm:$0xff]  ;;  %v2158_v1 = vand.u32 4294901760, %v2157_v6 }
 0x117   : > { %3302 = vmatprep.subr.mxu0 %v5874_v61  ;;  %3329 = vmatprep.subr.mxu1 %v5841_v44  ;;  %v4850_v44 = vand.u32 4294901760, %v285_v10  ;;  %v4895_v62 = vand.u32 4294901760, %v281_v49  ;;  %v4956_v61 = vsub.f32 %v278_v14, %v4935_v58 }
 0x118   : > { %3303 = vmatpush3.msra.mxu0 %v5875_v21  ;;  %3330 = vmatpush3.msra.mxu1 %v5842_v8  ;;  %v5879_v8 = vld [vmem:[#allocation24_spill] sm:$0xff]  ;;  %v5637_v21 = vand.u32 4294901760, %v4930_v15 }
 0x119   : > { %3304 = vmatprep.subr.mxu0 %v5876_v41  ;;  %3331 = vmatprep.subr.mxu1 %v5843_v26  ;;  %v5881_v26 = vld [vmem:[#allocation23_spill] sm:$0xff]  ;;  %v4871_v32 = vsub.f32 %v285_v10, %v4850_v44  ;;  %v4958_v10 = vand.u32 4294901760, %v276_v18  ;;  %v5634_v63 = vand.u32 4294901760, %v4956_v61 }
 0x11a   : > { %3305 = vmatpush3.msra.mxu0 %v5877_v24  ;;  %3332 = vmatpush3.msra.mxu1 %v5844_v36  ;;  %v5882_v36 = vld [vmem:[#allocation39_spill] sm:$0xff]  ;;  %v274_v24 = vld [vmem:[#allocation2 + $0x210] sm:$0xff] }
 0x11b   : > { %3306 = vmatprep.subr.mxu0 %v5878_v7  ;;  %3333 = vmatprep.subr.mxu1 %v5879_v8  ;;  %v5883_v39 = vand.u32 4294901760, %v5882_v36  ;;  %v5643_v34 = vand.u32 4294901760, %v4871_v32  ;;  %v2185_v36 = vsub.f32 %v4930_v15, %v5637_v21  ;;  %v2199_v14 = vsub.f32 %v4956_v61, %v5634_v63  ;;  %v292_v21 = vld [vmem:[#allocation2 + $0x2a0] sm:$0xff] }
 0x11c   : > { %3307 = vmatpush3.msra.mxu0 %v5880_v35  ;;  %3334 = vmatpush3.msra.mxu1 %v5881_v26  ;;  %v273_v35 = vld [vmem:[#allocation2 + $0x208] sm:$0xff] }
 0x11d   : > { %3308 = vmatprep.subr.mxu0 %v5883_v39  ;;  %3335 = vmatprep.subr.mxu1 %v4489_v4  ;;  %v3539_v4 = vmov 0.0   ;;  %v2150_v22 = vsub.f32 %v4871_v32, %v5643_v34  ;;  %v4982_v39 = vand.u32 4294901760, %v274_v24 }
 0x11e   : > { %3309 = vmatpush3.msra.mxu0 %v5885_v51  ;;  %1915 = vmatprep.mubr.f32.mxu0 %v5886_v28  ;;  %v272_v51 = vld [vmem:[#allocation2 + $0x200] sm:$0xff] }
 0x11f   : > { %3336 = vmatpush3.msra.mxu1 %v5887_v40  ;;  %1917 = vmatmul.mubr.f32.vlgmr.msra.gmra.mxu0 %v5888_v38  ;;  %v2151_v42 = vand.u32 4294901760, %v2150_v22  ;;  %v4990_v40 = vand.u32 4294901760, %v273_v35  ;;  %v4999_v12 = vand.u32 4294901760, %v272_v51 }
 0x120   : > { %3337 = vmatprep.subr.mxu1 %v4553_v25  ;;  %2026 = vmatprep.subr.mxu0 %v3539_v4  ;;  %v4893_v25 = vsub.f32 %v283_v17, %v4873_v45  ;;  %v5635_v17 = vand.u32 4294901760, %v4943_v53 }
 0x121   : > { %3338 = vmatpush3.msra.mxu1 %v4533_v33  ;;  %2028 = vmatpush1.msra.mxu0 %v4828_v29  ;;  %v4901_v33 = vsub.f32 %v282_v54, %v4877_v37  ;;  %v4977_v54 = vsub.f32 %v276_v18, %v4958_v10  ;;  %5889 = vst [vmem:[#allocation12_spill] sm:$0xff] %v4999_v12  ;;  %v296_v18 = vld [vmem:[#allocation2 + $0x2c0] sm:$0xff] }
 0x122   : > { %3339 = vmatprep.subr.mxu1 %v5848_v5  ;;  %2029 = vmatprep.subr.mxu0 %v3539_v4  ;;  %v2143_v5 = vsub.f32 %v4859_v43, %v5645_v60  ;;  %v5641_v11 = vand.u32 4294901760, %v4893_v25 }
 0x123   : > { %3340 = vmatpush3.msra.mxu1 %v4541_v59  ;;  %2031 = vmatpush1.msra.mxu0 %v4839_v31  ;;  %v2137_v59 = vand.u32 4294901760, %v2136_v23  ;;  %v2192_v23 = vsub.f32 %v4943_v53, %v5635_v17  ;;  %v5631_v22 = vand.u32 4294901760, %v4977_v54 }
 0x124   : > { %3341 = vmatprep.subr.mxu1 %v4594_v56  ;;  %2032 = vmatprep.subr.mxu0 %v3539_v4  ;;  %v4916_v56 = vsub.f32 %v281_v49, %v4895_v62  ;;  %v2144_v55 = vand.u32 4294901760, %v2143_v5  ;;  %v2164_v52 = vsub.f32 %v4893_v25, %v5641_v11  ;;  %v2186_v5 = vand.u32 4294901760, %v2185_v36 }
 0x125   : > { %3342 = vmatpush3.msra.mxu1 %v4605_v13  ;;  %2034 = vmatpush1.msra.mxu0 %v4850_v44  ;;  %v277_v13 = vld [vmem:[#allocation2 + $0x228] sm:$0xff] }
 0x126   : > { %3343 = vmatprep.subr.mxu1 %v4611_v3  ;;  %2035 = vmatprep.subr.mxu0 %v3539_v4  ;;  %v5640_v3 = vand.u32 4294901760, %v4901_v33  ;;  %v5638_v20 = vand.u32 4294901760, %v4916_v56  ;;  %v2165_v7 = vand.u32 4294901760, %v2164_v52  ;;  %v5019_v52 = vand.u32 4294901760, %v297_v47 }
 0x127   : > { %3344 = vmatpush3.msra.mxu1 %v4613_v57  ;;  %2019 = vmatprep.mubr.f32.mxu1 %v5886_v28  ;;  %v4939_v57 = vand.u32 4294901760, %v277_v13  ;;  %v4988_v28 = vsub.f32 %v275_v30, %v4966_v2  ;;  %v5024_v30 = vsub.f32 %v272_v51, %v4999_v12 }
 0x128   : > { %2037 = vmatpush1.msra.mxu0 %v4861_v19  ;;  %2021 = vmatmul.mubr.f32.vlgmr.msra.gmra.mxu1 %v5888_v38  ;;  %v2171_v0 = vsub.f32 %v4901_v33, %v5640_v3  ;;  %v2178_v8 = vsub.f32 %v4916_v56, %v5638_v20  ;;  %5890 = vst [vmem:[#allocation25_spill] sm:$0xff] %v5019_v52  ;;  %v206_v20 = vld [vmem:[%s3676_s10 + $0x20] sm:$0xff]  ;;  %v291_v3 = vld [vmem:[#allocation2 + $0x298] sm:$0xff] }
 0x129   : > { %2038 = vmatprep.subr.mxu0 %v3539_v4  ;;  %2132 = vmatprep.subr.mxu1 %v3539_v4  ;;  %v4964_v41 = vsub.f32 %v277_v13, %v4939_v57  ;;  %v5012_v13 = vsub.f32 %v273_v35, %v4990_v40  ;;  %v5633_v6 = vand.u32 4294901760, %v4988_v28  ;;  %v5087_v60 = vand.u32 4294901760, %v206_v20 }
 0x12a   : > { %2040 = vmatpush1.msra.mxu0 %v4873_v45  ;;  %2138 = vmatpush1.msra.mxu1 %v2137_v59  ;;  %v2172_v26 = vand.u32 4294901760, %v2171_v0  ;;  %v2179_v49 = vand.u32 4294901760, %v2178_v8  ;;  %v5003_v59 = vsub.f32 %v274_v24, %v4982_v39  ;;  %v2200_v24 = vand.u32 4294901760, %v2199_v14 }
 0x12b   : > { %2041 = vmatprep.subr.mxu0 %v3539_v4  ;;  %2139 = vmatprep.subr.mxu1 %v3539_v4  ;;  %v5632_v38 = vand.u32 4294901760, %v4964_v41  ;;  %v5030_v8 = vand.u32 4294901760, %v296_v18  ;;  %v2220_v36 = vsub.f32 %v4988_v28, %v5633_v6  ;;  %v5639_v51 = vand.u32 4294901760, %v5012_v13  ;;  %v293_v6 = vld [vmem:[#allocation2 + $0x2a8] sm:$0xff] }
 0x12c   : > { %2043 = vmatpush1.msra.mxu0 %v4877_v37  ;;  %2145 = vmatpush1.msra.mxu1 %v2144_v55  ;;  %v5636_v35 = vand.u32 4294901760, %v5003_v59  ;;  %v5067_v17 = vand.u32 4294901760, %v293_v6 }
 0x12d   : > { %2044 = vmatprep.subr.mxu0 %v3539_v4  ;;  %2146 = vmatprep.subr.mxu1 %v3539_v4  ;;  %v2206_v55 = vsub.f32 %v4964_v41, %v5632_v38  ;;  %5891 = vst [vmem:[#allocation11_spill] sm:$0xff] %v5030_v8  ;;  %v207_v38 = vld [vmem:[%s3676_s10 + $0x28] sm:$0xff]  ;;  %v2234_v63 = vsub.f32 %v5012_v13, %v5639_v51 }
 0x12e   : > { %2046 = vmatpush1.msra.mxu0 %v4895_v62  ;;  %2152 = vmatpush1.msra.mxu1 %v2151_v42  ;;  %v2193_v42 = vand.u32 4294901760, %v2192_v23  ;;  %v294_v23 = vld [vmem:[#allocation2 + $0x2b0] sm:$0xff] }
 0x12f   : > { %2047 = vmatprep.subr.mxu0 %v3539_v4  ;;  %2153 = vmatprep.subr.mxu1 %v3539_v4  ;;  %v2235_v9 = vand.u32 4294901760, %v2234_v63 }
 0x130   : > { %2049 = vmatpush1.msra.mxu0 %v4908_v50  ;;  %2159 = vmatpush1.msra.mxu1 %v2158_v1  ;;  %v295_v1 = vld [vmem:[#allocation2 + $0x2b8] sm:$0xff] }
 0x131   : > { %2050 = vmatprep.subr.mxu0 %v3539_v4  ;;  %2160 = vmatprep.subr.mxu1 %v3539_v4  ;;  %v5043_v14 = vand.u32 4294901760, %v295_v1 }
 0x132   : > { %2052 = vmatpush1.msra.mxu0 %v4921_v48  ;;  %2166 = vmatpush1.msra.mxu1 %v2165_v7  ;;  %v2213_v7 = vsub.f32 %v4977_v54, %v5631_v22 }
 0x133   : > { %2053 = vmatprep.subr.mxu0 %v3539_v4  ;;  %2167 = vmatprep.subr.mxu1 %v3539_v4  ;;  %5892 = vst [vmem:[#allocation22_spill] sm:$0xff] %v5043_v14 }
 0x134   : > { %2055 = vmatpush1.msra.mxu0 %v4935_v58  ;;  %2173 = vmatpush1.msra.mxu1 %v2172_v26  ;;  %v2207_v26 = vand.u32 4294901760, %v2206_v55  ;;  %v5644_v55 = vand.u32 4294901760, %v5024_v30 }
 0x135   : > { %2056 = vmatprep.subr.mxu0 %v3539_v4  ;;  %2174 = vmatprep.subr.mxu1 %v3539_v4 }
 0x136   : > { %2058 = vmatpush1.msra.mxu0 %v4939_v57  ;;  %2180 = vmatpush1.msra.mxu1 %v2179_v49 }
 0x137   : > { %2059 = vmatprep.subr.mxu0 %v3539_v4  ;;  %2181 = vmatprep.subr.mxu1 %v3539_v4  ;;  %v2960_v0 = vpop.f32.mrf.mxu0 }
 0x138   : > { %2061 = vmatpush1.msra.mxu0 %v4958_v10  ;;  %2187 = vmatpush1.msra.mxu1 %v2186_v5  ;;  %v5041_v5 = vsub.f32 %v297_v47, %v5019_v52  ;;  %v5051_v47 = vsub.f32 %v296_v18, %v5030_v8  ;;  %v2221_v18 = vand.u32 4294901760, %v2220_v36  ;;  %v290_v36 = vld [vmem:[#allocation2 + $0x290] sm:$0xff] }
 0x139   : > { %2062 = vmatprep.subr.mxu0 %v3539_v4  ;;  %2188 = vmatprep.subr.mxu1 %v3539_v4  ;;  %v2961_v49 = vpop.f32.mrf.mxu0 }
 0x13a   : > { %2064 = vmatpush1.msra.mxu0 %v4966_v2  ;;  %2194 = vmatpush1.msra.mxu1 %v2193_v42  ;;  %v2962_v22 = vadd.f32 %v2961_v49, %v2960_v0  ;;  %v2214_v42 = vand.u32 4294901760, %v2213_v7  ;;  %v2227_v0 = vsub.f32 %v5003_v59, %v5636_v35  ;;  %v5056_v49 = vand.u32 4294901760, %v294_v23 }
 0x13b   : > { %2065 = vmatprep.subr.mxu0 %v3539_v4  ;;  %2195 = vmatprep.subr.mxu1 %v3539_v4  ;;  %v5065_v7 = vsub.f32 %v295_v1, %v5043_v14  ;;  %v5649_v35 = vand.u32 4294901760, %v5041_v5 }
 0x13c   : > { %2067 = vmatpush1.msra.mxu0 %v4982_v39  ;;  %2201 = vmatpush1.msra.mxu1 %v2200_v24  ;;  %5893 = vst [vmem:[#allocation13_spill] sm:$0xff] %v5056_v49  ;;  %v300_v24 = vsel %vm298_vm0, %v207_v38, 0  ;;  %v2241_v38 = vsub.f32 %v5024_v30, %v5644_v55  ;;  %v2228_v1 = vand.u32 4294901760, %v2227_v0  ;;  %v5085_v55 = vand.u32 4294901760, %v292_v21 }
 0x13d   : > { %2068 = vmatprep.subr.mxu0 %v3539_v4  ;;  %2202 = vmatprep.subr.mxu1 %v3539_v4  ;;  %v5081_v11 = vand.u32 4294901760, %v300_v24 }
 0x13e   : > { %2070 = vmatpush1.msra.mxu0 %v4990_v40  ;;  %2208 = vmatpush1.msra.mxu1 %v2207_v26  ;;  %v5078_v26 = vsub.f32 %v294_v23, %v5056_v49  ;;  %5894 = vst [vmem:[#allocation28_spill] sm:$0xff] %v5085_v55  ;;  %v5091_v23 = vsub.f32 %v293_v6, %v5067_v17  ;;  %v2242_v63 = vand.u32 4294901760, %v2241_v38 }
 0x13f   : > { %2071 = vmatprep.subr.mxu0 %v3539_v4  ;;  %2209 = vmatprep.subr.mxu1 %v3539_v4  ;;  %v2995_v51 = vpop.f32.mrf.mxu1  ;;  %v5109_v46 = vsub.f32 %v300_v24, %v5081_v11  ;;  %v5114_v38 = vsub.f32 %v292_v21, %v5085_v55 }
 0x140   : > { %2073 = vmatpush1.msra.mxu0 %v4999_v12  ;;  %2215 = vmatpush1.msra.mxu1 %v2214_v42  ;;  %v2260_v42 = vsub.f32 %v5041_v5, %v5649_v35  ;;  %v5099_v12 = vand.u32 4294901760, %v291_v3 }
 0x141   : > { %2086 = vmatprep.subr.mxu0 %v3539_v4  ;;  %2216 = vmatprep.subr.mxu1 %v3539_v4  ;;  %v2996_v34 = vpop.f32.mrf.mxu1 }
 0x142   : > { %2088 = vmatpush2.msra.mxu0 %v5019_v52  ;;  %2222 = vmatpush1.msra.mxu1 %v2221_v18  ;;  %v2997_v0 = vadd.f32 %v2996_v34, %v2995_v51  ;;  %5895 = vst [vmem:[#allocation29_spill] sm:$0xff] %v5099_v12  ;;  %v5896_v18 = vand.u32 4294901760, %v5051_v47  ;;  %v289_v51 = vld [vmem:[#allocation2 + $0x288] sm:$0xff]  ;;  %v5129_v21 = vsub.f32 %v291_v3, %v5099_v12  ;;  %v5660_v52 = vand.u32 4294901760, %v5114_v38 }
 0x143   : > { %2089 = vmatprep.subr.mxu0 %v3539_v4  ;;  %2223 = vmatprep.subr.mxu1 %v3539_v4 }
 0x144   : > { %2091 = vmatpush2.msra.mxu0 %v5030_v8  ;;  %2229 = vmatpush1.msra.mxu1 %v2228_v1  ;;  %v5102_v6 = vadd.f32 %v2997_v0, %v2962_v22  ;;  %v2267_v35 = vsub.f32 %v5051_v47, %v5896_v18  ;;  %v5116_v1 = vand.u32 4294901760, %v290_v36  ;;  %v5119_v22 = vsub.f32 %v206_v20, %v5087_v60  ;;  %v288_v8 = vld [vmem:[#allocation2 + $0x280] sm:$0xff] }
 0x145   : > { %2092 = vmatprep.subr.mxu0 %v3539_v4  ;;  %2230 = vmatprep.subr.mxu1 %v3539_v4  ;;  %v2261_v0 = vand.u32 4294901760, %v2260_v42  ;;  %v5898_v18 = vand.u32 4294901760, %v5065_v7  ;;  %v5131_v20 = vand.u32 4294901760, %v289_v51  ;;  %v5899_v42 = vand.u32 4294901760, %v5078_v26 }
 0x146   : > { %5897 = vst [vmem:[#allocation30_spill] sm:$0xff] %v5119_v22  ;;  %2094 = vmatpush2.msra.mxu0 %v5043_v14  ;;  %2236 = vmatpush1.msra.mxu1 %v2235_v9  ;;  %v2268_v9 = vand.u32 4294901760, %v2267_v35  ;;  %v5141_v14 = vsub.f32 %v290_v36, %v5116_v1  ;;  %v5143_v3 = vand.u32 4294901760, %v288_v8 }
 0x147   : > { %v2274_v24 = vsub.f32 %v5065_v7, %v5898_v18  ;;  %2095 = vmatprep.subr.mxu0 %v3539_v4  ;;  %2237 = vmatprep.subr.mxu1 %v3539_v4  ;;  %v2281_v18 = vsub.f32 %v5078_v26, %v5899_v42  ;;  %v5900_v42 = vand.u32 4294901760, %v5091_v23  ;;  %v5154_v36 = vsub.f32 %v289_v51, %v5131_v20 }
 0x148   : > { %2097 = vmatpush2.msra.mxu0 %v5056_v49  ;;  %2243 = vmatpush1.msra.mxu1 %v2242_v63  ;;  %v2295_v51 = vsub.f32 %v5114_v38, %v5660_v52  ;;  %v5902_v49 = vand.u32 4294901760, %v5119_v22 }
 0x149   : > { %2098 = vmatprep.subr.mxu0 %v3539_v4  ;;  %2256 = vmatprep.subr.mxu1 %v3539_v4  ;;  %v2275_v35 = vand.u32 4294901760, %v2274_v24  ;;  %v2288_v34 = vsub.f32 %v5091_v23, %v5900_v42  ;;  %v2282_v63 = vand.u32 4294901760, %v2281_v18  ;;  %v5164_v42 = vsub.f32 %v288_v8, %v5143_v3 }
 0x14a   : > { %2100 = vmatpush2.msra.mxu0 %v5067_v17  ;;  %2262 = vmatpush2.msra.mxu1 %v2261_v0  ;;  %v5901_v0 = vand.u32 4294901760, %v5109_v46  ;;  %v2308_v18 = vand.u32 4294901760, %v5141_v14  ;;  %v5903_v8 = vand.u32 4294901760, %v5129_v21  ;;  %v2315_v52 = vand.u32 4294901760, %v5154_v36 }
 0x14b   : > { %2101 = vmatprep.subr.mxu0 %v3539_v4  ;;  %2263 = vmatprep.subr.mxu1 %v3539_v4 }
 0x14c   : > { %2103 = vmatpush2.msra.mxu0 %v5085_v55  ;;  %2269 = vmatpush2.msra.mxu1 %v2268_v9  ;;  %v2119_v24 = vsub.f32 %v5109_v46, %v5901_v0  ;;  %v2125_v9 = vsub.f32 %v5119_v22, %v5902_v49  ;;  %v2289_v0 = vand.u32 4294901760, %v2288_v34  ;;  %v2302_v55 = vsub.f32 %v5129_v21, %v5903_v8 }
 0x14d   : > { %2104 = vmatprep.subr.mxu0 %v3539_v4  ;;  %2270 = vmatprep.subr.mxu1 %v3539_v4  ;;  %v2322_v22 = vand.u32 4294901760, %v5164_v42 }
 0x14e   : > { %2106 = vmatpush2.msra.mxu0 %v5099_v12  ;;  %2276 = vmatpush2.msra.mxu1 %v2275_v35  ;;  %v2120_v49 = vand.u32 4294901760, %v2119_v24  ;;  %v2296_v35 = vand.u32 4294901760, %v2295_v51  ;;  %v2126_v34 = vand.u32 4294901760, %v2125_v9  ;;  %v2309_v12 = vsub.f32 %v5141_v14, %v2308_v18 }
 0x14f   : > { %2107 = vmatprep.subr.mxu0 %v3539_v4  ;;  %2277 = vmatprep.subr.mxu1 %v3539_v4  ;;  %v2316_v24 = vsub.f32 %v5154_v36, %v2315_v52  ;;  %v2323_v9 = vsub.f32 %v5164_v42, %v2322_v22 }
 0x150   : > { %2109 = vmatpush2.msra.mxu0 %v5116_v1  ;;  %2283 = vmatpush2.msra.mxu1 %v2282_v63  ;;  %v2303_v63 = vand.u32 4294901760, %v2302_v55  ;;  %v2310_v51 = vand.u32 4294901760, %v2309_v12 }
 0x151   : > { %2110 = vmatprep.subr.mxu0 %v3539_v4  ;;  %2284 = vmatprep.subr.mxu1 %v3539_v4  ;;  %v2317_v55 = vand.u32 4294901760, %v2316_v24  ;;  %v2324_v12 = vand.u32 4294901760, %v2323_v9 }
 0x152   : > { %2112 = vmatpush2.msra.mxu0 %v5131_v20  ;;  %2290 = vmatpush2.msra.mxu1 %v2289_v0 }
 0x153   : > { %2113 = vmatprep.subr.mxu0 %v3539_v4  ;;  %2291 = vmatprep.subr.mxu1 %v3539_v4 }
 0x154   : > { %2115 = vmatpush2.msra.mxu0 %v5143_v3  ;;  %2121 = vmatprep.mubr.f32.mxu0 %v2120_v49 }
 0x155   : > { %2297 = vmatpush2.msra.mxu1 %v2296_v35  ;;  %2127 = vmatmul.mubr.f32.vlgmr.msra.gmra.mxu0 %v2126_v34 }
 0x156   : > { %2298 = vmatprep.subr.mxu1 %v3539_v4  ;;  %2334 = vmatprep.subr.mxu0 %v3539_v4 }
 0x157   : > { %2304 = vmatpush2.msra.mxu1 %v2303_v63  ;;  %2337 = vmatpush1.msra.mxu0 %v4845_v16  ;;  %v3030_v0 = vpop.f32.mrf.mxu0 }
 0x158   : > { %2305 = vmatprep.subr.mxu1 %v3539_v4  ;;  %2338 = vmatprep.subr.mxu0 %v3539_v4 }
 0x159   : > { %2311 = vmatpush2.msra.mxu1 %v2310_v51  ;;  %2341 = vmatpush1.msra.mxu0 %v4859_v43  ;;  %v3031_v8 = vpop.f32.mrf.mxu0 }
 0x15a   : > { %2312 = vmatprep.subr.mxu1 %v3539_v4  ;;  %2342 = vmatprep.subr.mxu0 %v3539_v4  ;;  %v3032_v49 = vadd.f32 %v3031_v8, %v3030_v0  ;;  %v5904_v0 = vld [vmem:[#allocation12_spill] sm:$0xff]  ;;  %v5905_v8 = vld [vmem:[#allocation25_spill] sm:$0xff] }
 0x15b   : > { %2318 = vmatpush2.msra.mxu1 %v2317_v55  ;;  %2345 = vmatpush1.msra.mxu0 %v4871_v32 }
 0x15c   : > { %2319 = vmatprep.subr.mxu1 %v3539_v4  ;;  %2346 = vmatprep.subr.mxu0 %v3539_v4  ;;  %v781_v35 = vadd.f32 %v3032_v49, %v5102_v6  ;;  %v5906_v49 = vld [vmem:[#allocation11_spill] sm:$0xff] }
 0x15d   : > { %2325 = vmatpush2.msra.mxu1 %v2324_v12  ;;  %2327 = vmatprep.mubr.f32.mxu1 %v5081_v11 }
 0x15e   : > { %2349 = vmatpush1.msra.mxu0 %v4882_v27  ;;  %2329 = vmatmul.mubr.f32.vlgmr.msra.gmra.mxu1 %v5087_v60 }
 0x15f   : > { %2350 = vmatprep.subr.mxu0 %v3539_v4  ;;  %2460 = vmatprep.subr.mxu1 %v3539_v4 }
 0x160   : > { %2353 = vmatpush1.msra.mxu0 %v4893_v25  ;;  %2462 = vmatpush1.msra.mxu1 %v4828_v29  ;;  %v3065_v34 = vpop.f32.mrf.mxu1 }
 0x161   : > { %2354 = vmatprep.subr.mxu0 %v3539_v4  ;;  %2463 = vmatprep.subr.mxu1 %v3539_v4 }
 0x162   : > { %2357 = vmatpush1.msra.mxu0 %v4901_v33  ;;  %2465 = vmatpush1.msra.mxu1 %v4839_v31  ;;  %v3066_v6 = vpop.f32.mrf.mxu1 }
 0x163   : > { %2358 = vmatprep.subr.mxu0 %v3539_v4  ;;  %2466 = vmatprep.subr.mxu1 %v3539_v4  ;;  %v3067_v63 = vadd.f32 %v3066_v6, %v3065_v34  ;;  %v5907_v34 = vld [vmem:[#allocation22_spill] sm:$0xff] }
 0x164   : > { %2361 = vmatpush1.msra.mxu0 %v4916_v56  ;;  %2468 = vmatpush1.msra.mxu1 %v4850_v44 }
 0x165   : > { %2362 = vmatprep.subr.mxu0 %v3539_v4  ;;  %2469 = vmatprep.subr.mxu1 %v3539_v4  ;;  %v889_v24 = vadd.f32 %v3067_v63, %v781_v35 }
 0x166   : > { %2365 = vmatpush1.msra.mxu0 %v4930_v15  ;;  %2471 = vmatpush1.msra.mxu1 %v4861_v19 }
 0x167   : > { %2366 = vmatprep.subr.mxu0 %v3539_v4  ;;  %2472 = vmatprep.subr.mxu1 %v3539_v4 }
 0x168   : > { %2369 = vmatpush1.msra.mxu0 %v4943_v53  ;;  %2474 = vmatpush1.msra.mxu1 %v4873_v45 }
 0x169   : > { %2370 = vmatprep.subr.mxu0 %v3539_v4  ;;  %2475 = vmatprep.subr.mxu1 %v3539_v4 }
 0x16a   : > { %2373 = vmatpush1.msra.mxu0 %v4956_v61  ;;  %2477 = vmatpush1.msra.mxu1 %v4877_v37 }
 0x16b   : > { %2374 = vmatprep.subr.mxu0 %v3539_v4  ;;  %2478 = vmatprep.subr.mxu1 %v3539_v4 }
 0x16c   : > { %2377 = vmatpush1.msra.mxu0 %v4964_v41  ;;  %2480 = vmatpush1.msra.mxu1 %v4895_v62 }
 0x16d   : > { %2378 = vmatprep.subr.mxu0 %v3539_v4  ;;  %2481 = vmatprep.subr.mxu1 %v3539_v4 }
 0x16e   : > { %2381 = vmatpush1.msra.mxu0 %v4977_v54  ;;  %2483 = vmatpush1.msra.mxu1 %v4908_v50 }
 0x16f   : > { %2382 = vmatprep.subr.mxu0 %v3539_v4  ;;  %2484 = vmatprep.subr.mxu1 %v3539_v4 }
 0x170   : > { %2385 = vmatpush1.msra.mxu0 %v4988_v28  ;;  %2486 = vmatpush1.msra.mxu1 %v4921_v48 }
 0x171   : > { %2386 = vmatprep.subr.mxu0 %v3539_v4  ;;  %2487 = vmatprep.subr.mxu1 %v3539_v4 }
 0x172   : > { %2389 = vmatpush1.msra.mxu0 %v5003_v59  ;;  %2489 = vmatpush1.msra.mxu1 %v4935_v58 }
 0x173   : > { %2390 = vmatprep.subr.mxu0 %v3539_v4  ;;  %2490 = vmatprep.subr.mxu1 %v3539_v4 }
 0x174   : > { %2393 = vmatpush1.msra.mxu0 %v5012_v13  ;;  %2492 = vmatpush1.msra.mxu1 %v4939_v57 }
 0x175   : > { %2394 = vmatprep.subr.mxu0 %v3539_v4  ;;  %2493 = vmatprep.subr.mxu1 %v3539_v4 }
 0x176   : > { %2397 = vmatpush1.msra.mxu0 %v5024_v30  ;;  %2495 = vmatpush1.msra.mxu1 %v4958_v10 }
 0x177   : > { %2410 = vmatprep.subr.mxu0 %v3539_v4  ;;  %2496 = vmatprep.subr.mxu1 %v3539_v4 }
 0x178   : > { %2413 = vmatpush2.msra.mxu0 %v5041_v5  ;;  %2498 = vmatpush1.msra.mxu1 %v4966_v2 }
 0x179   : > { %2414 = vmatprep.subr.mxu0 %v3539_v4  ;;  %2499 = vmatprep.subr.mxu1 %v3539_v4  ;;  %v3100_v51 = vpop.f32.mrf.mxu0 }
 0x17a   : > { %2417 = vmatpush2.msra.mxu0 %v5051_v47  ;;  %2501 = vmatpush1.msra.mxu1 %v4982_v39 }
 0x17b   : > { %2418 = vmatprep.subr.mxu0 %v3539_v4  ;;  %2502 = vmatprep.subr.mxu1 %v3539_v4  ;;  %v3101_v9 = vpop.f32.mrf.mxu0 }
 0x17c   : > { %2421 = vmatpush2.msra.mxu0 %v5065_v7  ;;  %2504 = vmatpush1.msra.mxu1 %v4990_v40  ;;  %v3102_v55 = vadd.f32 %v3101_v9, %v3100_v51  ;;  %v5909_v9 = vld [vmem:[#allocation28_spill] sm:$0xff] }
 0x17d   : > { %2422 = vmatprep.subr.mxu0 %v3539_v4  ;;  %2505 = vmatprep.subr.mxu1 %v3539_v4 }
 0x17e   : > { %2425 = vmatpush2.msra.mxu0 %v5078_v26  ;;  %2507 = vmatpush1.msra.mxu1 %v5904_v0  ;;  %v1057_v12 = vadd.f32 %v3102_v55, %v889_v24  ;;  %v5908_v24 = vld [vmem:[#allocation13_spill] sm:$0xff]  ;;  %v5910_v55 = vld [vmem:[#allocation30_spill] sm:$0xff] }
 0x17f   : > { %2426 = vmatprep.subr.mxu0 %v3539_v4  ;;  %2520 = vmatprep.subr.mxu1 %v3539_v4 }
 0x180   : > { %2429 = vmatpush2.msra.mxu0 %v5091_v23  ;;  %2522 = vmatpush2.msra.mxu1 %v5905_v8 }
 0x181   : > { %2430 = vmatprep.subr.mxu0 %v3539_v4  ;;  %2523 = vmatprep.subr.mxu1 %v3539_v4 }
 0x182   : > { %2433 = vmatpush2.msra.mxu0 %v5114_v38  ;;  %2525 = vmatpush2.msra.mxu1 %v5906_v49  ;;  %v3135_v35 = vpop.f32.mrf.mxu1 }
 0x183   : > { %2434 = vmatprep.subr.mxu0 %v3539_v4  ;;  %2526 = vmatprep.subr.mxu1 %v3539_v4 }
 0x184   : > { %2437 = vmatpush2.msra.mxu0 %v5129_v21  ;;  %2528 = vmatpush2.msra.mxu1 %v5907_v34  ;;  %v3136_v6 = vpop.f32.mrf.mxu1 }
 0x185   : > { %2438 = vmatprep.subr.mxu0 %v3539_v4  ;;  %2529 = vmatprep.subr.mxu1 %v3539_v4  ;;  %v3137_v63 = vadd.f32 %v3136_v6, %v3135_v35  ;;  %v5912_v35 = vand.u32 4294901760, %v4845_v16  ;;  %v5913_v6 = vand.u32 4294901760, %v4859_v43  ;;  %v5915_v16 = vand.u32 4294901760, %v5109_v46 }
 0x186   : > { %2441 = vmatpush2.msra.mxu0 %v5141_v14  ;;  %2531 = vmatpush2.msra.mxu1 %v5908_v24  ;;  %v5916_v43 = vand.u32 4294901760, %v4882_v27  ;;  %v5920_v27 = vand.u32 4294901760, %v4916_v56  ;;  %v5923_v56 = vand.u32 4294901760, %v4956_v61 }
 0x187   : > { %2442 = vmatprep.subr.mxu0 %v3539_v4  ;;  %2532 = vmatprep.subr.mxu1 %v3539_v4  ;;  %v1161_v51 = vadd.f32 %v3137_v63, %v1057_v12  ;;  %v5911_v12 = vld [vmem:[#allocation29_spill] sm:$0xff]  ;;  %v5914_v63 = vand.u32 4294901760, %v4871_v32  ;;  %v5918_v32 = vand.u32 4294901760, %v4893_v25  ;;  %v5921_v25 = vand.u32 4294901760, %v4930_v15 }
 0x188   : > { %2445 = vmatpush2.msra.mxu0 %v5154_v36  ;;  %2534 = vmatpush2.msra.mxu1 %v5067_v17  ;;  %v5924_v15 = vand.u32 4294901760, %v4964_v41  ;;  %v5927_v41 = vand.u32 4294901760, %v5003_v59 }
 0x189   : > { %2446 = vmatprep.subr.mxu0 %v3539_v4  ;;  %2535 = vmatprep.subr.mxu1 %v3539_v4 }
 0x18a   : > { %2449 = vmatpush2.msra.mxu0 %v5164_v42  ;;  %2452 = vmatprep.mubr.f32.mxu0 %v5109_v46  ;;  %v5919_v46 = vand.u32 4294901760, %v4901_v33  ;;  %v5922_v33 = vand.u32 4294901760, %v4943_v53  ;;  %v5926_v53 = vand.u32 4294901760, %v4988_v28  ;;  %v5935_v28 = vand.u32 4294901760, %v5114_v38 }
 0x18b   : > { %2537 = vmatpush2.msra.mxu1 %v5909_v9  ;;  %2455 = vmatmul.mubr.f32.vlgmr.msra.gmra.mxu0 %v5910_v55 }
 0x18c   : > { %2538 = vmatprep.subr.mxu1 %v3539_v4  ;;  %2562 = vmatprep.subr.mxu0 %v3539_v4 }
 0x18d   : > { %2540 = vmatpush2.msra.mxu1 %v5911_v12  ;;  %2566 = vmatpush1.msra.mxu0 %v5912_v35  ;;  %v5917_v35 = vand.u32 4294901760, %v5910_v55 }
 0x18e   : > { %2541 = vmatprep.subr.mxu1 %v3539_v4  ;;  %2567 = vmatprep.subr.mxu0 %v3539_v4 }
 0x18f   : > { %2543 = vmatpush2.msra.mxu1 %v5116_v1  ;;  %2571 = vmatpush1.msra.mxu0 %v5913_v6  ;;  %v2923_v6 = vld [vmem:[%s5488_s1] ss:$0 sm:$0xff] }
 0x190   : > { %2544 = vmatprep.subr.mxu1 %v3539_v4  ;;  %2572 = vmatprep.subr.mxu0 %v3539_v4 }
 0x191   : > { %2546 = vmatpush2.msra.mxu1 %v5131_v20  ;;  %2576 = vmatpush1.msra.mxu0 %v5914_v63 }
 0x192   : > { %2547 = vmatprep.subr.mxu1 %v3539_v4  ;;  %2577 = vmatprep.subr.mxu0 %v3539_v4 }
 0x193   : > { %2549 = vmatpush2.msra.mxu1 %v5143_v3  ;;  %2553 = vmatprep.mubr.f32.mxu1 %v5915_v16 }
 0x194   : > { %2581 = vmatpush1.msra.mxu0 %v5916_v43  ;;  %2557 = vmatmul.mubr.f32.vlgmr.msra.gmra.mxu1 %v5917_v35 }
 0x195   : > { %2582 = vmatprep.subr.mxu0 %v3539_v4  ;;  %2712 = vmatprep.subr.mxu1 %v3539_v4 }
 0x196   : > { %2586 = vmatpush1.msra.mxu0 %v5918_v32  ;;  %2714 = vmatpush1.msra.mxu1 %v4828_v29 }
 0x197   : > { %2587 = vmatprep.subr.mxu0 %v3539_v4  ;;  %2715 = vmatprep.subr.mxu1 %v3539_v4 }
 0x198   : > { %2591 = vmatpush1.msra.mxu0 %v5919_v46  ;;  %2717 = vmatpush1.msra.mxu1 %v4839_v31 }
 0x199   : > { %2592 = vmatprep.subr.mxu0 %v3539_v4  ;;  %2718 = vmatprep.subr.mxu1 %v3539_v4 }
 0x19a   : > { %2596 = vmatpush1.msra.mxu0 %v5920_v27  ;;  %2720 = vmatpush1.msra.mxu1 %v4850_v44 }
 0x19b   : > { %2597 = vmatprep.subr.mxu0 %v3539_v4  ;;  %2721 = vmatprep.subr.mxu1 %v3539_v4  ;;  %v3170_v29 = vpop.f32.mrf.mxu0 }
 0x19c   : > { %2601 = vmatpush1.msra.mxu0 %v5921_v25  ;;  %2723 = vmatpush1.msra.mxu1 %v4861_v19 }
 0x19d   : > { %2602 = vmatprep.subr.mxu0 %v3539_v4  ;;  %2724 = vmatprep.subr.mxu1 %v3539_v4  ;;  %v3171_v31 = vpop.f32.mrf.mxu0 }
 0x19e   : > { %2606 = vmatpush1.msra.mxu0 %v5922_v33  ;;  %2726 = vmatpush1.msra.mxu1 %v4873_v45  ;;  %v3172_v44 = vadd.f32 %v3171_v31, %v3170_v29  ;;  %v5925_v45 = vand.u32 4294901760, %v4977_v54  ;;  %v5928_v54 = vand.u32 4294901760, %v5012_v13 }
 0x19f   : > { %2607 = vmatprep.subr.mxu0 %v3539_v4  ;;  %2727 = vmatprep.subr.mxu1 %v3539_v4 }
 0x1a0   : > { %2611 = vmatpush1.msra.mxu0 %v5923_v56  ;;  %2729 = vmatpush1.msra.mxu1 %v4877_v37  ;;  %v1273_v19 = vadd.f32 %v3172_v44, %v1161_v51 }
 0x1a1   : > { %2612 = vmatprep.subr.mxu0 %v3539_v4  ;;  %2730 = vmatprep.subr.mxu1 %v3539_v4 }
 0x1a2   : > { %2616 = vmatpush1.msra.mxu0 %v5924_v15  ;;  %2732 = vmatpush1.msra.mxu1 %v4895_v62 }
 0x1a3   : > { %2617 = vmatprep.subr.mxu0 %v3539_v4  ;;  %2733 = vmatprep.subr.mxu1 %v3539_v4 }
 0x1a4   : > { %2621 = vmatpush1.msra.mxu0 %v5925_v45  ;;  %2735 = vmatpush1.msra.mxu1 %v4908_v50  ;;  %v3205_v37 = vpop.f32.mrf.mxu1 }
 0x1a5   : > { %2622 = vmatprep.subr.mxu0 %v3539_v4  ;;  %2736 = vmatprep.subr.mxu1 %v3539_v4 }
 0x1a6   : > { %2626 = vmatpush1.msra.mxu0 %v5926_v53  ;;  %2738 = vmatpush1.msra.mxu1 %v4921_v48  ;;  %v3206_v62 = vpop.f32.mrf.mxu1  ;;  %v5929_v48 = vand.u32 4294901760, %v5024_v30 }
 0x1a7   : > { %2627 = vmatprep.subr.mxu0 %v3539_v4  ;;  %2739 = vmatprep.subr.mxu1 %v3539_v4  ;;  %v3207_v61 = vadd.f32 %v3206_v62, %v3205_v37 }
 0x1a8   : > { %2631 = vmatpush1.msra.mxu0 %v5927_v41  ;;  %2741 = vmatpush1.msra.mxu1 %v4935_v58  ;;  %v5930_v58 = vand.u32 4294901760, %v5041_v5 }
 0x1a9   : > { %2632 = vmatprep.subr.mxu0 %v3539_v4  ;;  %2742 = vmatprep.subr.mxu1 %v3539_v4  ;;  %v1505_v50 = vadd.f32 %v3207_v61, %v1273_v19 }
 0x1aa   : > { %2636 = vmatpush1.msra.mxu0 %v5928_v54  ;;  %2744 = vmatpush1.msra.mxu1 %v4939_v57  ;;  %v5931_v57 = vand.u32 4294901760, %v5051_v47 }
 0x1ab   : > { %2637 = vmatprep.subr.mxu0 %v3539_v4  ;;  %2745 = vmatprep.subr.mxu1 %v3539_v4 }
 0x1ac   : > { %2641 = vmatpush1.msra.mxu0 %v5929_v48  ;;  %2747 = vmatpush1.msra.mxu1 %v4958_v10  ;;  %v5932_v10 = vand.u32 4294901760, %v5065_v7 }
 0x1ad   : > { %2654 = vmatprep.subr.mxu0 %v3539_v4  ;;  %2748 = vmatprep.subr.mxu1 %v3539_v4 }
 0x1ae   : > { %2658 = vmatpush2.msra.mxu0 %v5930_v58  ;;  %2750 = vmatpush1.msra.mxu1 %v4966_v2  ;;  %v5933_v2 = vand.u32 4294901760, %v5078_v26 }
 0x1af   : > { %2659 = vmatprep.subr.mxu0 %v3539_v4  ;;  %2751 = vmatprep.subr.mxu1 %v3539_v4 }
 0x1b0   : > { %2663 = vmatpush2.msra.mxu0 %v5931_v57  ;;  %2753 = vmatpush1.msra.mxu1 %v4982_v39  ;;  %v5934_v39 = vand.u32 4294901760, %v5091_v23 }
 0x1b1   : > { %2664 = vmatprep.subr.mxu0 %v3539_v4  ;;  %2754 = vmatprep.subr.mxu1 %v3539_v4 }
 0x1b2   : > { %2668 = vmatpush2.msra.mxu0 %v5932_v10  ;;  %2756 = vmatpush1.msra.mxu1 %v4990_v40  ;;  %v5936_v40 = vand.u32 4294901760, %v5129_v21 }
 0x1b3   : > { %2669 = vmatprep.subr.mxu0 %v3539_v4  ;;  %2757 = vmatprep.subr.mxu1 %v3539_v4 }
 0x1b4   : > { %2673 = vmatpush2.msra.mxu0 %v5933_v2  ;;  %2759 = vmatpush1.msra.mxu1 %v5904_v0 }
 0x1b5   : > { %2674 = vmatprep.subr.mxu0 %v3539_v4  ;;  %2772 = vmatprep.subr.mxu1 %v3539_v4 }
 0x1b6   : > { %2678 = vmatpush2.msra.mxu0 %v5934_v39  ;;  %2774 = vmatpush2.msra.mxu1 %v5905_v8 }
 0x1b7   : > { %2679 = vmatprep.subr.mxu0 %v3539_v4  ;;  %2775 = vmatprep.subr.mxu1 %v3539_v4 }
 0x1b8   : > { %2683 = vmatpush2.msra.mxu0 %v5935_v28  ;;  %2777 = vmatpush2.msra.mxu1 %v5906_v49 }
 0x1b9   : > { %2684 = vmatprep.subr.mxu0 %v3539_v4  ;;  %2778 = vmatprep.subr.mxu1 %v3539_v4 }
 0x1ba   : > { %2688 = vmatpush2.msra.mxu0 %v5936_v40  ;;  %2780 = vmatpush2.msra.mxu1 %v5907_v34 }
 0x1bb   : > { %2689 = vmatprep.subr.mxu0 %v3539_v4  ;;  %2781 = vmatprep.subr.mxu1 %v3539_v4 }
 0x1bc   : > { %2693 = vmatpush2.msra.mxu0 %v2308_v18  ;;  %2783 = vmatpush2.msra.mxu1 %v5908_v24 }
 0x1bd   : > { %2694 = vmatprep.subr.mxu0 %v3539_v4  ;;  %2784 = vmatprep.subr.mxu1 %v3539_v4  ;;  %v3240_v59 = vpop.f32.mrf.mxu0 }
 0x1be   : > { %2698 = vmatpush2.msra.mxu0 %v2315_v52  ;;  %2786 = vmatpush2.msra.mxu1 %v5067_v17 }
 0x1bf   : > { %2699 = vmatprep.subr.mxu0 %v3539_v4  ;;  %2787 = vmatprep.subr.mxu1 %v3539_v4  ;;  %v3241_v13 = vpop.f32.mrf.mxu0 }
 0x1c0   : > { %2703 = vmatpush2.msra.mxu0 %v2322_v22  ;;  %2705 = vmatprep.mubr.f32.mxu0 %v5081_v11  ;;  %v3242_v30 = vadd.f32 %v3241_v13, %v3240_v59 }
 0x1c1   : > { %2789 = vmatpush2.msra.mxu1 %v5909_v9  ;;  %2707 = vmatmul.mubr.f32.vlgmr.msra.gmra.mxu0 %v5087_v60 }
 0x1c2   : > { %2790 = vmatprep.subr.mxu1 %v3539_v4  ;;  %v1643_v52 = vadd.f32 %v3242_v30, %v1505_v50  ;;  %2803 = vmatprep.mubr.f32.mxu1 %v5081_v11 }
 0x1c3   : > { %2792 = vmatpush2.msra.mxu1 %v5911_v12 }
 0x1c4   : > { %2793 = vmatprep.subr.mxu1 %v3539_v4 }
 0x1c5   : > { %2795 = vmatpush2.msra.mxu1 %v5116_v1 }
 0x1c6   : > { %2796 = vmatprep.subr.mxu1 %v3539_v4  ;;  %v3275_v17 = vpop.f32.mrf.mxu1 }
 0x1c7   : > { %2798 = vmatpush2.msra.mxu1 %v5131_v20 }
 0x1c8   : > { %2799 = vmatprep.subr.mxu1 %v3539_v4  ;;  %v3276_v5 = vpop.f32.mrf.mxu1 }
 0x1c9   : > { %2801 = vmatpush2.msra.mxu1 %v5143_v3  ;;  %v3277_v14 = vadd.f32 %v3276_v5, %v3275_v17 }
 0x1ca   : > { %2805 = vmatmul.mubr.f32.vlgmr.msra.gmra.mxu1 %v5087_v60 }
 0x1cb   : > { %v1751_v11 = vadd.f32 %v3277_v14, %v1643_v52 }
 0x1df   : > { %v3310_v47 = vpop.f32.mrf.mxu0 }
 0x1e1   : > { %v3311_v7 = vpop.f32.mrf.mxu0 }
 0x1e2   : > { %v3312_v26 = vadd.f32 %v3311_v7, %v3310_v47 }
 0x1e4   : > { %v1919_v23 = vadd.f32 %v3312_v26, %v1751_v11 }
 0x1e8   : > { %v3345_v38 = vpop.f32.mrf.mxu1 }
 0x1ea   : > { %v3346_v1 = vpop.f32.mrf.mxu1 }
 0x1eb   : > { %v3347_v22 = vadd.f32 %v3346_v1, %v3345_v38 }
 0x1ed   : > { %v2023_v21 = vadd.f32 %v3347_v22, %v1919_v23 }
 0x215   : > { %v2128_v36 = vpop.f32.mrf.mxu0 }
 0x216   : > { %v2129_v20 = vadd.f32 %v2128_v36, %v2023_v21 }
 0x217   : > { %v2130_v42 = vpop.f32.mrf.mxu0 }
 0x21e   : > { %v2330_v4 = vpop.f32.mrf.mxu1 }
 0x21f   : > { %v2331_v18 = vadd.f32 %v2330_v4, %v2129_v20 }
 0x220   : > { %v2332_v3 = vpop.f32.mrf.mxu1 }
 0x24b   : > { %v2456_v0 = vpop.f32.mrf.mxu0 }
 0x24c   : > { %v2457_v51 = vadd.f32 %v2456_v0, %v2331_v18 }
 0x24d   : > { %v2458_v8 = vpop.f32.mrf.mxu0 }
 0x254   : > { %v2558_v60 = vpop.f32.mrf.mxu1 }
 0x255   : > { %v2559_v9 = vadd.f32 %v2558_v60, %v2457_v51 }
 0x256   : > { %v2560_v49 = vpop.f32.mrf.mxu1 }
 0x281   : > { %v2708_v34 = vpop.f32.mrf.mxu0 }
 0x282   : > { %v2709_v55 = vadd.f32 %v2708_v34, %v2559_v9 }
 0x283   : > { %v2710_v24 = vpop.f32.mrf.mxu0 }
 0x28a   : > { %v2806_v12 = vpop.f32.mrf.mxu1 }
 0x28b   : > { %v2807_v63 = vadd.f32 %v2806_v12, %v2709_v55 }
 0x28c   : > { %v2808_v16 = vpop.f32.mrf.mxu1 }
 0x28d   : > { %v2817_v43 = vmul.f32 %v2923_v6, %v2807_v63 }
 0x28f   : > { %2818 = vst [vmem:[%s201_s25] sm:$0xff] %v2817_v43 }
 0x290   : > { %3478 = shalt.err (!%p3475_p0)
}
 0x291   : > { %s3479_s11 = scalar_lea.hbm %s2831_s30, 128  ;;  %s3483_s26 = scalar_lea.hbm %s5490_s3, 256 }
 0x292   : > { %p3480_p11 = scmp.ne.s32.totalorder %s2831_s30, %s3479_s11  ;;  %p3484_p10 = scmp.lt.s32.totalorder %s2831_s30, %s5490_s3 }
 0x293   : > { %p3485_p1 = scmp.lt.s32.totalorder %s3483_s26, %s3479_s11 }
 0x294   : > { %p3481_p9 = pnand %p3480_p11, %p5937_p8 }
 0x295   : > { %p3486_p4 = por %p3485_p1, %p3484_p10 }
 0x296   : > { %p3482_p12 = pneg %p3481_p9 }
 0x298   : > { %p3487_p6 = pnand %p3486_p4, %p3482_p12 }
 0x29a   : > { %3490 = shalt.err (!%p3487_p6)
}
 0x29b   : > { %3357 = dma.vmem_to_hbm [thread:$0]  (%p5937_p8), %s2834_s27, 128, %s2831_s30, %s2820_s4  }
 0x29c PF: > { %s2845_s20 = sand.u32 1, %s3521_s12   ;;  %p5938_p3 = scmp.ne.s32.totalorder %s5666_s19, 0 }
 0x29d   : > { %p5939_p5 = scmp.ge.s32.totalorder %s3533_s15, 2  ;;  %s2846_s21 = scalar_lea.sflag [#allocation4], %s2845_s20 }
 0x29f   : > { %p3368_p7 = pnand %p5939_p5, %p5938_p3 }
 0x2a1   : > { %p3369_p2 = pneg %p3368_p7 }
 0x2a3   : > { %3516 = dma.done.wait (%p3369_p2), %s2846_s21, 128  }
 0x2a4   : > { %3518 = vsyncadd (%p3369_p2), %s2846_s21, 4294967168  ;;  %p17_p13 = scmp.ge.s32.totalorder %s3615_s24, 4   ;;  %s5940_s12 = smov %s3525_s13 }
 0x2a5   : > { %s5941_s13 = smov %s3529_s14  ;;  %s5942_s14 = smov %s3632_s5 }
 0x2a6   : > { %s5943_s15 = smov %s3615_s24  ;;  %19 = sbr.rel (!%p17_p13) target bundleno = 6 (0x6), region = 82 }
 0x2ab   :  { %2851 = vsyncpa [#allocation3], 1 }
 0x2ac   :  { %2853 = vsyncpa [#allocation3 + $0x1], 1 }
 0x2ad   :  { %2854 = vsyncpa [#allocation6], 1 }
 0x2ae   :  { %2856 = vsyncpa [#allocation6 + $0x1], 1 }
 0x2af   :  { %2857 = vsyncpa [#allocation4], 1 }
 0x2b0   :  { %2859 = vsyncpa [#allocation4 + $0x1], 1 }

</bundles_post_ra>
